<compile_context>
chip_gen: v6e
topology: v6e:2x2x1
jax: 0.10.0
libtpu: 0.0.40
codegen_flags: <defaults>
</compile_context>

<pallas_src>
import functools

import jax
import jax.numpy as jnp
from jax import lax
from jax.experimental import pallas as pl
from jax.experimental.pallas import tpu as pltpu

EPS = 1e-5
LANE = 128
SUBLANE = 8
F_SUB = 16          # bf16 sublane packing: keep frame tiles a multiple of 16 so
                    # the (tb, f_tile, D) -> (tb*f_tile, D) merge is layout-free


def _rup(n, m):
    return ((n + m - 1) // m) * m


def _pad_to(x, shape):
    return jnp.pad(x, [(0, t - s) for s, t in zip(x.shape, shape)])


# ---------------------------------------------------------------------------
# Fused Pallas kernel — entire forward pass
# ---------------------------------------------------------------------------

def _fused_forward_kernel(
        vx_ref, ax_ref,                                   # (tb, f_tile, Din_pad) bf16
        w_vr_ref, b_vr_ref, w_ar_ref, b_ar_ref,           # dim-reduction (BN folded)
        w_vfc_ref, b_vfc_ref, w_afc_ref, b_afc_ref,       # per-modality FC
        vb_w1_ref, vb_b1_ref, vb_w2_ref, vb_b2_ref,       # video id blocks (stacked)
        ab_w1_ref, ab_b1_ref, ab_w2_ref, ab_b2_ref,       # audio id blocks (stacked)
        w_cv_ref, w_ca_ref, b_c_ref,                      # concat FC (weight split)
        cb_w1_ref, cb_b1_ref, cb_w2_ref, cb_b2_ref,       # concat id blocks (stacked)
        w_out_ref, b_out_ref,                             # final linear
        o_ref,                                            # (tb, out_pad) f32
        vmax_ref, amax_ref,                               # running frame-max scratch
        *, tb, f_tile, n_vb, n_ab, n_cb):

    f_idx = pl.program_id(1)
    last_f = pl.num_programs(1) - 1

    def mm(x, w):
        # MXU matmul: bf16 operands, f32 accumulation (elementwise stays f32).
        return jnp.dot(x.astype(jnp.bfloat16), w, preferred_element_type=jnp.float32)

    def relu(x):
        return jnp.maximum(x, 0.0)

    # ---- reset running-max accumulators at the start of each batch block ----
    @pl.when(f_idx == 0)
    def _init():
        # ReLU outputs are >= 0, so 0 is a safe identity for the frame max.
        vmax_ref[...] = jnp.zeros_like(vmax_ref)
        amax_ref[...] = jnp.zeros_like(amax_ref)

    # ---- AlternateFC: per-frame-block FC + running max over frames ----------
    def alt_fc_step(x_ref, w_ref, b_ref, max_ref):
        d_in = x_ref.shape[-1]
        x = x_ref[...].reshape(tb * f_tile, d_in)           # one big MXU matmul
        y = relu(mm(x, w_ref[...]) + b_ref[...])            # (tb*f_tile, Dout) f32
        y = y.reshape(tb, f_tile, y.shape[-1])
        # Padded frames are edge-replicated on the host, so no mask is needed.
        max_ref[...] = jnp.maximum(max_ref[...], jnp.max(y, axis=1))

    alt_fc_step(vx_ref, w_vr_ref, b_vr_ref, vmax_ref)
    alt_fc_step(ax_ref, w_ar_ref, b_ar_ref, amax_ref)

    # ---- ResNetLike trunk: only after the last frame block ------------------
    def id_block(x, w1, b1, w2, b2):
        h = relu(mm(x, w1) + b1)
        return relu(mm(h, w2) + b2 + x)                     # residual + ReLU

    def run_blocks(x, n, w1_ref, b1_ref, w2_ref, b2_ref):
        if n == 0:
            return x
        if n <= 2:                                          # small: static unroll
            for i in range(n):
                x = id_block(x, w1_ref[i], b1_ref[i], w2_ref[i], b2_ref[i])
            return x
        # deeper stacks: fori_loop bounds live ranges / compile time
        return lax.fori_loop(
            0, n,
            lambda i, xx: id_block(xx, w1_ref[i], b1_ref[i], w2_ref[i], b2_ref[i]),
            x)

    @pl.when(f_idx == last_f)
    def _trunk():
        v = relu(mm(vmax_ref[...], w_vfc_ref[...]) + b_vfc_ref[...])
        a = relu(mm(amax_ref[...], w_afc_ref[...]) + b_afc_ref[...])
        v = run_blocks(v, n_vb, vb_w1_ref, vb_b1_ref, vb_w2_ref, vb_b2_ref)
        a = run_blocks(a, n_ab, ab_w1_ref, ab_b1_ref, ab_w2_ref, ab_b2_ref)
        # concat([v, a]) @ Wc  ==  v @ Wc_v + a @ Wc_a   (concat eliminated)
        x = relu(mm(v, w_cv_ref[...]) + mm(a, w_ca_ref[...]) + b_c_ref[...])
        x = run_blocks(x, n_cb, cb_w1_ref, cb_b1_ref, cb_w2_ref, cb_b2_ref)
        o_ref[...] = mm(x, w_out_ref[...]) + b_out_ref[...]


# ---------------------------------------------------------------------------
# Parameter preparation: fold BN into Linear, pad, cast weights to bf16
# ---------------------------------------------------------------------------

def _fold_fc_bn(p, din_pad, dout_pad):
    s = p["gamma"] * lax.rsqrt(p["var"] + EPS)                       # (1, dout)
    w = _pad_to(p["w"] * s, (din_pad, dout_pad)).astype(jnp.bfloat16)
    b = _pad_to((p["b"] - p["mean"]) * s + p["beta"],
                (1, dout_pad)).astype(jnp.float32)
    return w, b


def _fold_id_blocks(blocks, d_pad):
    w1s, b1s, w2s, b2s = [], [], [], []
    for blk in blocks:
        w1, b1 = _fold_fc_bn(blk["fc1"], d_pad, d_pad)
        w2, b2 = _fold_fc_bn(blk["fc2"], d_pad, d_pad)
        w1s.append(w1); b1s.append(b1); w2s.append(w2); b2s.append(b2)
    return jnp.stack(w1s), jnp.stack(b1s), jnp.stack(w2s), jnp.stack(b2s)


# ---------------------------------------------------------------------------
# Forward wrapper: pad/tile inputs, build specs, single pallas_call
# ---------------------------------------------------------------------------

def early_concat_alternate_forward(params, video, audio, *, batch_tile=128,
                                   target_input_block_bytes=4 << 20):
    """batch_tile: 128 is a good default for v5e; use 256 on v6e/v7x."""
    B, F, rgb = video.shape
    _, _, aud = audio.shape
    r = params["resnet"]
    vr = params["dim_reduction_video"]["w"].shape[1]
    ar = params["dim_reduction_audio"]["w"].shape[1]
    inner = r["video_fc"]["w"].shape[1]
    out_sz = r["out"]["w"].shape[1]

    # ---- batch tiling: fill the MXU, but keep >=2 batch blocks when possible
    # (so the "parallel" axis shards across v7x's 2 TensorCores), and never pad
    # a small batch up to a huge tile.
    b_rounded = _rup(B, SUBLANE)
    if b_rounded >= 2 * SUBLANE:
        tb = min(batch_tile, _rup(pl.cdiv(b_rounded, 2), SUBLANE))
    else:
        tb = b_rounded
    b_pad = _rup(B, tb)

    # ---- feature padding (lane) ----
    rgb_pad, aud_pad = _rup(rgb, LANE), _rup(aud, LANE)
    vr_pad, ar_pad = _rup(vr, LANE), _rup(ar, LANE)
    in_pad, out_pad = _rup(inner, LANE), _rup(out_sz, LANE)

    # ---- frame tiling: keep the streamed input block near the DMA sweet spot
    bytes_per_frame = tb * max(rgb_pad, aud_pad) * 2                 # bf16
    f_tile = max(F_SUB, (target_input_block_bytes // bytes_per_frame) // F_SUB * F_SUB)
    f_tile = min(f_tile, _rup(F, F_SUB))
    f_pad = _rup(F, f_tile)

    # --- fold BN + pad + bf16-cast all layer weights ---
    w_vr, b_vr = _fold_fc_bn(params["dim_reduction_video"], rgb_pad, vr_pad)
    w_ar, b_ar = _fold_fc_bn(params["dim_reduction_audio"], aud_pad, ar_pad)
    w_vfc, b_vfc = _fold_fc_bn(r["video_fc"], vr_pad, in_pad)
    w_afc, b_afc = _fold_fc_bn(r["audio_fc"], ar_pad, in_pad)
    vb_w1, vb_b1, vb_w2, vb_b2 = _fold_id_blocks(r["video_blocks"], in_pad)
    ab_w1, ab_b1, ab_w2, ab_b2 = _fold_id_blocks(r["audio_blocks"], in_pad)

    cp = r["concat_fc"]                       # split rows so concat is never built
    s = cp["gamma"] * lax.rsqrt(cp["var"] + EPS)
    wc = cp["w"] * s
    w_cv = _pad_to(wc[:inner], (in_pad, in_pad)).astype(jnp.bfloat16)
    w_ca = _pad_to(wc[inner:], (in_pad, in_pad)).astype(jnp.bfloat16)
    b_c = _pad_to((cp["b"] - cp["mean"]) * s + cp["beta"],
                  (1, in_pad)).astype(jnp.float32)

    cb_w1, cb_b1, cb_w2, cb_b2 = _fold_id_blocks(r["concat_blocks"], in_pad)
    w_out = _pad_to(r["out"]["w"], (in_pad, out_pad)).astype(jnp.bfloat16)
    b_out = _pad_to(r["out"]["b"], (1, out_pad)).astype(jnp.float32)

    # --- pad inputs: zero-pad batch/features, edge-replicate padded frames ---
    # (duplicated frames can never change the per-column frame max -> no
    #  in-kernel masking required).  Pass bf16 inputs to skip the cast.
    def _prep_input(x, d_pad):
        x = jnp.pad(x, ((0, b_pad - B), (0, 0), (0, d_pad - x.shape[-1])))
        x = jnp.pad(x, ((0, 0), (0, f_pad - F), (0, 0)), mode="edge")
        return x if x.dtype == jnp.bfloat16 else x.astype(jnp.bfloat16)

    v_in = _prep_input(video, rgb_pad)
    a_in = _prep_input(audio, aud_pad)

    weights = [w_vr, b_vr, w_ar, b_ar,
               w_vfc, b_vfc, w_afc, b_afc,
               vb_w1, vb_b1, vb_w2, vb_b2,
               ab_w1, ab_b1, ab_w2, ab_b2,
               w_cv, w_ca, b_c,
               cb_w1, cb_b1, cb_w2, cb_b2,
               w_out, b_out]

    def _const_spec(shape):
        # Grid-invariant operand: single-buffer it (fetched once, never refetched).
        nd = len(shape)
        index_map = lambda b, f, _nd=nd: (0,) * _nd
        try:
            return pl.BlockSpec(shape, index_map, pipeline_mode=pl.Buffered(1))
        except (TypeError, ValueError, AttributeError):
            return pl.BlockSpec(shape, index_map)        # fallback: double-buffered

    in_specs = [
        pl.BlockSpec((tb, f_tile, rgb_pad), lambda b, f: (b, f, 0)),
        pl.BlockSpec((tb, f_tile, aud_pad), lambda b, f: (b, f, 0)),
    ] + [_const_spec(w.shape) for w in weights]

    # --- explicit VMEM budget: weights (1x) + double-buffered streamed blocks
    #     + output + scratch + activation headroom; capped for v7x's 64 MiB.
    weight_bytes = sum(int(w.size) * w.dtype.itemsize for w in weights)
    in_block_bytes = tb * f_tile * (rgb_pad + aud_pad) * 2 * 2       # 2 bufs, bf16
    out_block_bytes = tb * out_pad * 4 * 2
    scratch_bytes = tb * (vr_pad + ar_pad) * 4
    act_bytes = 8 * tb * max(in_pad, vr_pad, ar_pad, out_pad) * 4
    budget = weight_bytes + in_block_bytes + out_block_bytes + scratch_bytes + act_bytes
    vmem_limit = int(min(max(budget * 1.25, 32 * (1 << 20)), 56 * (1 << 20)))

    kernel = functools.partial(
        _fused_forward_kernel,
        tb=tb, f_tile=f_tile,
        n_vb=len(r["video_blocks"]),
        n_ab=len(r["audio_blocks"]),
        n_cb=len(r["concat_blocks"]))

    out = pl.pallas_call(
        kernel,
        out_shape=jax.ShapeDtypeStruct((b_pad, out_pad), jnp.float32),
        grid=(b_pad // tb, f_pad // f_tile),
        in_specs=in_specs,
        out_specs=pl.BlockSpec((tb, out_pad), lambda b, f: (b, 0)),
        scratch_shapes=[pltpu.VMEM((tb, vr_pad), jnp.float32),
                        pltpu.VMEM((tb, ar_pad), jnp.float32)],
        compiler_params=pltpu.CompilerParams(
            # batch blocks shard across TCs (v7x); frame axis is a reduction.
            dimension_semantics=("parallel", "arbitrary"),
            vmem_limit_bytes=vmem_limit),
    )(v_in, a_in, *weights)

    return out[:B, :out_sz]


# ---------------------------------------------------------------------------
# Deterministic parameter initialization (synthetic, no checkpoint loading)
# ---------------------------------------------------------------------------

def _init_fc_bn(key, din, dout):
    kw, kb, km, kv = jax.random.split(key, 4)
    bound = 1.0 / (din ** 0.5)
    return dict(
        w=jax.random.uniform(kw, (din, dout), jnp.float32, -bound, bound),
        b=jax.random.uniform(kb, (1, dout), jnp.float32, -bound, bound),
        gamma=jnp.ones((1, dout), jnp.float32),
        beta=jnp.zeros((1, dout), jnp.float32),
        mean=0.1 * jax.random.normal(km, (1, dout), jnp.float32),
        var=1.0 + 0.1 * jax.random.uniform(kv, (1, dout), jnp.float32),
    )


def _init_linear(key, din, dout):
    kw, kb = jax.random.split(key)
    bound = 1.0 / (din ** 0.5)
    return dict(
        w=jax.random.uniform(kw, (din, dout), jnp.float32, -bound, bound),
        b=jax.random.uniform(kb, (1, dout), jnp.float32, -bound, bound),
    )


def _init_id_block(key, d):
    k1, k2 = jax.random.split(key)
    return dict(fc1=_init_fc_bn(k1, d, d), fc2=_init_fc_bn(k2, d, d))


def init_params(key, rgb_size, audio_size, video_reduced_sz, audio_reduced_sz,
                inner_size, output_size, av_id_block_num=1, concat_id_block_num=1):
    keys = jax.random.split(key, 9)
    resnet = dict(
        video_fc=_init_fc_bn(keys[2], video_reduced_sz, inner_size),
        audio_fc=_init_fc_bn(keys[3], audio_reduced_sz, inner_size),
        video_blocks=[_init_id_block(k, inner_size)
                      for k in jax.random.split(keys[4], av_id_block_num)],
        audio_blocks=[_init_id_block(k, inner_size)
                      for k in jax.random.split(keys[5], av_id_block_num)],
        concat_fc=_init_fc_bn(keys[6], 2 * inner_size, inner_size),
        concat_blocks=[_init_id_block(k, inner_size)
                       for k in jax.random.split(keys[7], concat_id_block_num)],
        out=_init_linear(keys[8], inner_size, output_size),
    )
    return dict(
        dim_reduction_video=_init_fc_bn(keys[0], rgb_size, video_reduced_sz),
        dim_reduction_audio=_init_fc_bn(keys[1], audio_size, audio_reduced_sz),
        resnet=resnet,
    )


# ---------------------------------------------------------------------------
# Pure-JAX f32 reference (original, unfolded semantics) — correctness only
# ---------------------------------------------------------------------------

def _ref_bn(x, p):
    return (x - p["mean"]) / jnp.sqrt(p["var"] + EPS) * p["gamma"] + p["beta"]


def _ref_alt_fc(x, p):
    y = jnp.maximum(_ref_bn(jnp.einsum("bfd,de->bfe", x, p["w"]) + p["b"], p), 0.0)
    return jnp.max(y, axis=1)


def _ref_fc_bn_relu(x, p):
    return jnp.maximum(_ref_bn(x @ p["w"] + p["b"], p), 0.0)


def _ref_id_block(x, p):
    h = _ref_fc_bn_relu(x, p["fc1"])
    y = _ref_bn(h @ p["fc2"]["w"] + p["fc2"]["b"], p["fc2"])
    return jnp.maximum(y + x, 0.0)


def _ref_forward(params, video, audio):
    v = _ref_alt_fc(video, params["dim_reduction_video"]).reshape(video.shape[0], -1)
    a = _ref_alt_fc(audio, params["dim_reduction_audio"])
    r = params["resnet"]
    v = _ref_fc_bn_relu(v, r["video_fc"])
    a = _ref_fc_bn_relu(a, r["audio_fc"])
    for blk in r["video_blocks"]:
        v = _ref_id_block(v, blk)
    for blk in r["audio_blocks"]:
        a = _ref_id_block(a, blk)
    x = _ref_fc_bn_relu(jnp.concatenate([v, a], axis=-1), r["concat_fc"])
    for blk in r["concat_blocks"]:
        x = _ref_id_block(x, blk)
    return x @ r["out"]["w"] + r["out"]["b"]


# ---------------------------------------------------------------------------

if __name__ == "__main__":
    # Small shapes consistent with the module's forward pass.
    BATCH, N_FRAMES = 2, 8
    RGB_SIZE, AUDIO_SIZE = 32, 16
    VIDEO_REDUCED, AUDIO_REDUCED = 32, 16
    INNER_SIZE, OUTPUT_SIZE = 64, 24

    key = jax.random.PRNGKey(0)
    k_params, k_video, k_audio = jax.random.split(key, 3)

    params = init_params(k_params, RGB_SIZE, AUDIO_SIZE, VIDEO_REDUCED,
                         AUDIO_REDUCED, INNER_SIZE, OUTPUT_SIZE,
                         av_id_block_num=1, concat_id_block_num=1)

    video = jax.random.normal(k_video, (BATCH, N_FRAMES, RGB_SIZE), jnp.float32)
    audio = jax.random.normal(k_audio, (BATCH, N_FRAMES, AUDIO_SIZE), jnp.float32)

    fwd = jax.jit(early_concat_alternate_forward)
    out = jax.block_until_ready(fwd(params, video, audio))

    assert out.shape == (BATCH, OUTPUT_SIZE), out.shape
    ref = _ref_forward(params, video, audio)
    # Tolerance accounts for bf16 MXU operands (f32 accumulation) vs f32 reference.
    err = float(jnp.max(jnp.abs(out - ref)))
    assert jnp.allclose(out, ref, atol=2e-2, rtol=2e-2), err

    print("KERNEL_OK")
</pallas_src>

<mosaic_0001>
module attributes {stable_mosaic.version = 11 : i64} {
  func.func @_fused_forward_kernel(%arg0: i32, %arg1: i32, %arg2: memref<8x16x128xbf16, #tpu.memory_space<vmem>>, %arg3: memref<8x16x128xbf16, #tpu.memory_space<vmem>>, %arg4: memref<128x128xbf16, #tpu.memory_space<vmem>>, %arg5: memref<1x128xf32, #tpu.memory_space<vmem>>, %arg6: memref<128x128xbf16, #tpu.memory_space<vmem>>, %arg7: memref<1x128xf32, #tpu.memory_space<vmem>>, %arg8: memref<128x128xbf16, #tpu.memory_space<vmem>>, %arg9: memref<1x128xf32, #tpu.memory_space<vmem>>, %arg10: memref<128x128xbf16, #tpu.memory_space<vmem>>, %arg11: memref<1x128xf32, #tpu.memory_space<vmem>>, %arg12: memref<1x128x128xbf16, #tpu.memory_space<vmem>>, %arg13: memref<1x1x128xf32, #tpu.memory_space<vmem>>, %arg14: memref<1x128x128xbf16, #tpu.memory_space<vmem>>, %arg15: memref<1x1x128xf32, #tpu.memory_space<vmem>>, %arg16: memref<1x128x128xbf16, #tpu.memory_space<vmem>>, %arg17: memref<1x1x128xf32, #tpu.memory_space<vmem>>, %arg18: memref<1x128x128xbf16, #tpu.memory_space<vmem>>, %arg19: memref<1x1x128xf32, #tpu.memory_space<vmem>>, %arg20: memref<128x128xbf16, #tpu.memory_space<vmem>>, %arg21: memref<128x128xbf16, #tpu.memory_space<vmem>>, %arg22: memref<1x128xf32, #tpu.memory_space<vmem>>, %arg23: memref<1x128x128xbf16, #tpu.memory_space<vmem>>, %arg24: memref<1x1x128xf32, #tpu.memory_space<vmem>>, %arg25: memref<1x128x128xbf16, #tpu.memory_space<vmem>>, %arg26: memref<1x1x128xf32, #tpu.memory_space<vmem>>, %arg27: memref<128x128xbf16, #tpu.memory_space<vmem>>, %arg28: memref<1x128xf32, #tpu.memory_space<vmem>>, %arg29: memref<8x128xf32, #tpu.memory_space<vmem>>, %arg30: memref<8x128xf32, #tpu.memory_space<vmem>>, %arg31: memref<8x128xf32, #tpu.memory_space<vmem>>) attributes {dimension_semantics = [#tpu.dimension_semantics<parallel>, #tpu.dimension_semantics<arbitrary>], iteration_bounds = array<i64: 1, 1>, scalar_prefetch = 0 : i64, scratch_operands = 2 : i64, tpu.core_type = #tpu.core_type<tc>, window_params = [{transform_indices = @transform_0, window_bounds = array<i64: 8, 16, 128>}, {transform_indices = @transform_1, window_bounds = array<i64: 8, 16, 128>}, {pipeline_mode = #tpu.pipeline_mode<synchronous>, transform_indices = @transform_2, window_bounds = array<i64: 128, 128>}, {pipeline_mode = #tpu.pipeline_mode<synchronous>, transform_indices = @transform_3, window_bounds = array<i64: 1, 128>}, {pipeline_mode = #tpu.pipeline_mode<synchronous>, transform_indices = @transform_4, window_bounds = array<i64: 128, 128>}, {pipeline_mode = #tpu.pipeline_mode<synchronous>, transform_indices = @transform_5, window_bounds = array<i64: 1, 128>}, {pipeline_mode = #tpu.pipeline_mode<synchronous>, transform_indices = @transform_6, window_bounds = array<i64: 128, 128>}, {pipeline_mode = #tpu.pipeline_mode<synchronous>, transform_indices = @transform_7, window_bounds = array<i64: 1, 128>}, {pipeline_mode = #tpu.pipeline_mode<synchronous>, transform_indices = @transform_8, window_bounds = array<i64: 128, 128>}, {pipeline_mode = #tpu.pipeline_mode<synchronous>, transform_indices = @transform_9, window_bounds = array<i64: 1, 128>}, {pipeline_mode = #tpu.pipeline_mode<synchronous>, transform_indices = @transform_10, window_bounds = array<i64: 1, 128, 128>}, {pipeline_mode = #tpu.pipeline_mode<synchronous>, transform_indices = @transform_11, window_bounds = array<i64: 1, 1, 128>}, {pipeline_mode = #tpu.pipeline_mode<synchronous>, transform_indices = @transform_12, window_bounds = array<i64: 1, 128, 128>}, {pipeline_mode = #tpu.pipeline_mode<synchronous>, transform_indices = @transform_13, window_bounds = array<i64: 1, 1, 128>}, {pipeline_mode = #tpu.pipeline_mode<synchronous>, transform_indices = @transform_14, window_bounds = array<i64: 1, 128, 128>}, {pipeline_mode = #tpu.pipeline_mode<synchronous>, transform_indices = @transform_15, window_bounds = array<i64: 1, 1, 128>}, {pipeline_mode = #tpu.pipeline_mode<synchronous>, transform_indices = @transform_16, window_bounds = array<i64: 1, 128, 128>}, {pipeline_mode = #tpu.pipeline_mode<synchronous>, transform_indices = @transform_17, window_bounds = array<i64: 1, 1, 128>}, {pipeline_mode = #tpu.pipeline_mode<synchronous>, transform_indices = @transform_18, window_bounds = array<i64: 128, 128>}, {pipeline_mode = #tpu.pipeline_mode<synchronous>, transform_indices = @transform_19, window_bounds = array<i64: 128, 128>}, {pipeline_mode = #tpu.pipeline_mode<synchronous>, transform_indices = @transform_20, window_bounds = array<i64: 1, 128>}, {pipeline_mode = #tpu.pipeline_mode<synchronous>, transform_indices = @transform_21, window_bounds = array<i64: 1, 128, 128>}, {pipeline_mode = #tpu.pipeline_mode<synchronous>, transform_indices = @transform_22, window_bounds = array<i64: 1, 1, 128>}, {pipeline_mode = #tpu.pipeline_mode<synchronous>, transform_indices = @transform_23, window_bounds = array<i64: 1, 128, 128>}, {pipeline_mode = #tpu.pipeline_mode<synchronous>, transform_indices = @transform_24, window_bounds = array<i64: 1, 1, 128>}, {pipeline_mode = #tpu.pipeline_mode<synchronous>, transform_indices = @transform_25, window_bounds = array<i64: 128, 128>}, {pipeline_mode = #tpu.pipeline_mode<synchronous>, transform_indices = @transform_26, window_bounds = array<i64: 1, 128>}, {transform_indices = @transform_27, window_bounds = array<i64: 8, 128>}]} {
    %c0_i32 = arith.constant 0 : i32
    %0 = arith.cmpi eq, %arg1, %c0_i32 : i32
    %1 = arith.extui %0 : i1 to i32
    %c0_i32_0 = arith.constant 0 : i32
    %2 = arith.cmpi ne, %1, %c0_i32_0 : i32
    scf.if %2 {
      %cst_29 = arith.constant 0.000000e+00 : f32
      %34 = vector.broadcast %cst_29 : f32 to vector<8x128xf32>
      %c0_30 = arith.constant 0 : index
      %c0_31 = arith.constant 0 : index
      %35 = vector.load %arg30[%c0_30, %c0_31] : memref<8x128xf32, #tpu.memory_space<vmem>>, vector<8x128xf32>
      tpu.vector_store %arg30[%c0_30, %c0_31], %34 {strides = array<i32>} : memref<8x128xf32, #tpu.memory_space<vmem>>, vector<8x128xf32>,
      %cst_32 = arith.constant 0.000000e+00 : f32
      %36 = vector.broadcast %cst_32 : f32 to vector<8x128xf32>
      %c0_33 = arith.constant 0 : index
      %c0_34 = arith.constant 0 : index
      %37 = vector.load %arg31[%c0_33, %c0_34] : memref<8x128xf32, #tpu.memory_space<vmem>>, vector<8x128xf32>
      tpu.vector_store %arg31[%c0_33, %c0_34], %36 {strides = array<i32>} : memref<8x128xf32, #tpu.memory_space<vmem>>, vector<8x128xf32>,
    } else {
    }
    %c0 = arith.constant 0 : index
    %c0_1 = arith.constant 0 : index
    %c0_2 = arith.constant 0 : index
    %3 = vector.load %arg2[%c0, %c0_1, %c0_2] : memref<8x16x128xbf16, #tpu.memory_space<vmem>>, vector<8x16x128xbf16>
    %4 = vector.shape_cast %3 : vector<8x16x128xbf16> to vector<128x128xbf16>
    %c0_3 = arith.constant 0 : index
    %c0_4 = arith.constant 0 : index
    %5 = vector.load %arg4[%c0_3, %c0_4] : memref<128x128xbf16, #tpu.memory_space<vmem>>, vector<128x128xbf16>
    %cst = arith.constant dense<0.000000e+00> : vector<128x128xf32>
    %6 = tpu.matmul %4, %5, %cst {dimension_numbers = #tpu.dot_dimension_numbers<[1], [0], [0], [1], [0, 0, 1, 1], [], []>} : vector<128x128xbf16>, vector<128x128xbf16>, vector<128x128xf32> -> vector<128x128xf32>
    %c0_5 = arith.constant 0 : index
    %c0_6 = arith.constant 0 : index
    %7 = vector.load %arg5[%c0_5, %c0_6] : memref<1x128xf32, #tpu.memory_space<vmem>>, vector<1x128xf32>
    %8 = vector.broadcast %7 : vector<1x128xf32> to vector<128x128xf32>
    %9 = arith.addf %6, %8 : vector<128x128xf32>
    %cst_7 = arith.constant 0.000000e+00 : f32
    %10 = vector.broadcast %cst_7 : f32 to vector<128x128xf32>
    %11 = arith.maximumf %9, %10 : vector<128x128xf32>
    %12 = vector.shape_cast %11 : vector<128x128xf32> to vector<8x16x128xf32>
    %c0_8 = arith.constant 0 : index
    %c0_9 = arith.constant 0 : index
    %13 = vector.load %arg30[%c0_8, %c0_9] : memref<8x128xf32, #tpu.memory_space<vmem>>, vector<8x128xf32>
    %cst_10 = arith.constant dense<0xFF800000> : vector<8x128xf32>
    %14 = vector.multi_reduction <maximumf>, %12, %cst_10 [1] : vector<8x16x128xf32> to vector<8x128xf32>
    %15 = arith.maximumf %13, %14 : vector<8x128xf32>
    %c0_11 = arith.constant 0 : index
    %c0_12 = arith.constant 0 : index
    %16 = vector.load %arg30[%c0_11, %c0_12] : memref<8x128xf32, #tpu.memory_space<vmem>>, vector<8x128xf32>
    tpu.vector_store %arg30[%c0_11, %c0_12], %15 {strides = array<i32>} : memref<8x128xf32, #tpu.memory_space<vmem>>, vector<8x128xf32>,
    %c0_13 = arith.constant 0 : index
    %c0_14 = arith.constant 0 : index
    %c0_15 = arith.constant 0 : index
    %17 = vector.load %arg3[%c0_13, %c0_14, %c0_15] : memref<8x16x128xbf16, #tpu.memory_space<vmem>>, vector<8x16x128xbf16>
    %18 = vector.shape_cast %17 : vector<8x16x128xbf16> to vector<128x128xbf16>
    %c0_16 = arith.constant 0 : index
    %c0_17 = arith.constant 0 : index
    %19 = vector.load %arg6[%c0_16, %c0_17] : memref<128x128xbf16, #tpu.memory_space<vmem>>, vector<128x128xbf16>
    %cst_18 = arith.constant dense<0.000000e+00> : vector<128x128xf32>
    %20 = tpu.matmul %18, %19, %cst_18 {dimension_numbers = #tpu.dot_dimension_numbers<[1], [0], [0], [1], [0, 0, 1, 1], [], []>} : vector<128x128xbf16>, vector<128x128xbf16>, vector<128x128xf32> -> vector<128x128xf32>
    %c0_19 = arith.constant 0 : index
    %c0_20 = arith.constant 0 : index
    %21 = vector.load %arg7[%c0_19, %c0_20] : memref<1x128xf32, #tpu.memory_space<vmem>>, vector<1x128xf32>
    %22 = vector.broadcast %21 : vector<1x128xf32> to vector<128x128xf32>
    %23 = arith.addf %20, %22 : vector<128x128xf32>
    %cst_21 = arith.constant 0.000000e+00 : f32
    %24 = vector.broadcast %cst_21 : f32 to vector<128x128xf32>
    %25 = arith.maximumf %23, %24 : vector<128x128xf32>
    %26 = vector.shape_cast %25 : vector<128x128xf32> to vector<8x16x128xf32>
    %c0_22 = arith.constant 0 : index
    %c0_23 = arith.constant 0 : index
    %27 = vector.load %arg31[%c0_22, %c0_23] : memref<8x128xf32, #tpu.memory_space<vmem>>, vector<8x128xf32>
    %cst_24 = arith.constant dense<0xFF800000> : vector<8x128xf32>
    %28 = vector.multi_reduction <maximumf>, %26, %cst_24 [1] : vector<8x16x128xf32> to vector<8x128xf32>
    %29 = arith.maximumf %27, %28 : vector<8x128xf32>
    %c0_25 = arith.constant 0 : index
    %c0_26 = arith.constant 0 : index
    %30 = vector.load %arg31[%c0_25, %c0_26] : memref<8x128xf32, #tpu.memory_space<vmem>>, vector<8x128xf32>
    tpu.vector_store %arg31[%c0_25, %c0_26], %29 {strides = array<i32>} : memref<8x128xf32, #tpu.memory_space<vmem>>, vector<8x128xf32>,
    %c0_i32_27 = arith.constant 0 : i32
    %31 = arith.cmpi eq, %arg1, %c0_i32_27 : i32
    %32 = arith.extui %31 : i1 to i32
    %c0_i32_28 = arith.constant 0 : i32
    %33 = arith.cmpi ne, %32, %c0_i32_28 : i32
    scf.if %33 {
      %c0_29 = arith.constant 0 : index
      %c0_30 = arith.constant 0 : index
      %34 = vector.load %arg30[%c0_29, %c0_30] : memref<8x128xf32, #tpu.memory_space<vmem>>, vector<8x128xf32>
      %c0_31 = arith.constant 0 : index
      %c0_32 = arith.constant 0 : index
      %35 = vector.load %arg8[%c0_31, %c0_32] : memref<128x128xbf16, #tpu.memory_space<vmem>>, vector<128x128xbf16>
      %36 = arith.truncf %34 : vector<8x128xf32> to vector<8x128xbf16>
      %cst_33 = arith.constant dense<0.000000e+00> : vector<8x128xf32>
      %37 = tpu.matmul %36, %35, %cst_33 {dimension_numbers = #tpu.dot_dimension_numbers<[1], [0], [0], [1], [0, 0, 1, 1], [], []>} : vector<8x128xbf16>, vector<128x128xbf16>, vector<8x128xf32> -> vector<8x128xf32>
      %c0_34 = arith.constant 0 : index
      %c0_35 = arith.constant 0 : index
      %38 = vector.load %arg9[%c0_34, %c0_35] : memref<1x128xf32, #tpu.memory_space<vmem>>, vector<1x128xf32>
      %39 = vector.broadcast %38 : vector<1x128xf32> to vector<8x128xf32>
      %40 = arith.addf %37, %39 : vector<8x128xf32>
      %cst_36 = arith.constant 0.000000e+00 : f32
      %41 = vector.broadcast %cst_36 : f32 to vector<8x128xf32>
      %42 = arith.maximumf %40, %41 : vector<8x128xf32>
      %c0_37 = arith.constant 0 : index
      %c0_38 = arith.constant 0 : index
      %43 = vector.load %arg31[%c0_37, %c0_38] : memref<8x128xf32, #tpu.memory_space<vmem>>, vector<8x128xf32>
      %c0_39 = arith.constant 0 : index
      %c0_40 = arith.constant 0 : index
      %44 = vector.load %arg10[%c0_39, %c0_40] : memref<128x128xbf16, #tpu.memory_space<vmem>>, vector<128x128xbf16>
      %45 = arith.truncf %43 : vector<8x128xf32> to vector<8x128xbf16>
      %cst_41 = arith.constant dense<0.000000e+00> : vector<8x128xf32>
      %46 = tpu.matmul %45, %44, %cst_41 {dimension_numbers = #tpu.dot_dimension_numbers<[1], [0], [0], [1], [0, 0, 1, 1], [], []>} : vector<8x128xbf16>, vector<128x128xbf16>, vector<8x128xf32> -> vector<8x128xf32>
      %c0_42 = arith.constant 0 : index
      %c0_43 = arith.constant 0 : index
      %47 = vector.load %arg11[%c0_42, %c0_43] : memref<1x128xf32, #tpu.memory_space<vmem>>, vector<1x128xf32>
      %48 = vector.broadcast %47 : vector<1x128xf32> to vector<8x128xf32>
      %49 = arith.addf %46, %48 : vector<8x128xf32>
      %cst_44 = arith.constant 0.000000e+00 : f32
      %50 = vector.broadcast %cst_44 : f32 to vector<8x128xf32>
      %51 = arith.maximumf %49, %50 : vector<8x128xf32>
      %c0_45 = arith.constant 0 : index
      %c0_46 = arith.constant 0 : index
      %c0_47 = arith.constant 0 : index
      %52 = vector.load %arg12[%c0_45, %c0_46, %c0_47] : memref<1x128x128xbf16, #tpu.memory_space<vmem>>, vector<1x128x128xbf16>
      %53 = vector.shape_cast %52 : vector<1x128x128xbf16> to vector<128x128xbf16>
      %c0_48 = arith.constant 0 : index
      %c0_49 = arith.constant 0 : index
      %c0_50 = arith.constant 0 : index
      %54 = vector.load %arg13[%c0_48, %c0_49, %c0_50] : memref<1x1x128xf32, #tpu.memory_space<vmem>>, vector<1x1x128xf32>
      %55 = vector.shape_cast %54 : vector<1x1x128xf32> to vector<1x128xf32>
      %c0_51 = arith.constant 0 : index
      %c0_52 = arith.constant 0 : index
      %c0_53 = arith.constant 0 : index
      %56 = vector.load %arg14[%c0_51, %c0_52, %c0_53] : memref<1x128x128xbf16, #tpu.memory_space<vmem>>, vector<1x128x128xbf16>
      %57 = vector.shape_cast %56 : vector<1x128x128xbf16> to vector<128x128xbf16>
      %c0_54 = arith.constant 0 : index
      %c0_55 = arith.constant 0 : index
      %c0_56 = arith.constant 0 : index
      %58 = vector.load %arg15[%c0_54, %c0_55, %c0_56] : memref<1x1x128xf32, #tpu.memory_space<vmem>>, vector<1x1x128xf32>
      %59 = vector.shape_cast %58 : vector<1x1x128xf32> to vector<1x128xf32>
      %60 = arith.truncf %42 : vector<8x128xf32> to vector<8x128xbf16>
      %cst_57 = arith.constant dense<0.000000e+00> : vector<8x128xf32>
      %61 = tpu.matmul %60, %53, %cst_57 {dimension_numbers = #tpu.dot_dimension_numbers<[1], [0], [0], [1], [0, 0, 1, 1], [], []>} : vector<8x128xbf16>, vector<128x128xbf16>, vector<8x128xf32> -> vector<8x128xf32>
      %62 = vector.broadcast %55 : vector<1x128xf32> to vector<8x128xf32>
      %63 = arith.addf %61, %62 : vector<8x128xf32>
      %cst_58 = arith.constant 0.000000e+00 : f32
      %64 = vector.broadcast %cst_58 : f32 to vector<8x128xf32>
      %65 = arith.maximumf %63, %64 : vector<8x128xf32>
      %66 = arith.truncf %65 : vector<8x128xf32> to vector<8x128xbf16>
      %cst_59 = arith.constant dense<0.000000e+00> : vector<8x128xf32>
      %67 = tpu.matmul %66, %57, %cst_59 {dimension_numbers = #tpu.dot_dimension_numbers<[1], [0], [0], [1], [0, 0, 1, 1], [], []>} : vector<8x128xbf16>, vector<128x128xbf16>, vector<8x128xf32> -> vector<8x128xf32>
      %68 = vector.broadcast %59 : vector<1x128xf32> to vector<8x128xf32>
      %69 = arith.addf %67, %68 : vector<8x128xf32>
      %70 = arith.addf %69, %42 : vector<8x128xf32>
      %cst_60 = arith.constant 0.000000e+00 : f32
      %71 = vector.broadcast %cst_60 : f32 to vector<8x128xf32>
      %72 = arith.maximumf %70, %71 : vector<8x128xf32>
      %c0_61 = arith.constant 0 : index
      %c0_62 = arith.constant 0 : index
      %c0_63 = arith.constant 0 : index
      %73 = vector.load %arg16[%c0_61, %c0_62, %c0_63] : memref<1x128x128xbf16, #tpu.memory_space<vmem>>, vector<1x128x128xbf16>
      %74 = vector.shape_cast %73 : vector<1x128x128xbf16> to vector<128x128xbf16>
      %c0_64 = arith.constant 0 : index
      %c0_65 = arith.constant 0 : index
      %c0_66 = arith.constant 0 : index
      %75 = vector.load %arg17[%c0_64, %c0_65, %c0_66] : memref<1x1x128xf32, #tpu.memory_space<vmem>>, vector<1x1x128xf32>
      %76 = vector.shape_cast %75 : vector<1x1x128xf32> to vector<1x128xf32>
      %c0_67 = arith.constant 0 : index
      %c0_68 = arith.constant 0 : index
      %c0_69 = arith.constant 0 : index
      %77 = vector.load %arg18[%c0_67, %c0_68, %c0_69] : memref<1x128x128xbf16, #tpu.memory_space<vmem>>, vector<1x128x128xbf16>
      %78 = vector.shape_cast %77 : vector<1x128x128xbf16> to vector<128x128xbf16>
      %c0_70 = arith.constant 0 : index
      %c0_71 = arith.constant 0 : index
      %c0_72 = arith.constant 0 : index
      %79 = vector.load %arg19[%c0_70, %c0_71, %c0_72] : memref<1x1x128xf32, #tpu.memory_space<vmem>>, vector<1x1x128xf32>
      %80 = vector.shape_cast %79 : vector<1x1x128xf32> to vector<1x128xf32>
      %81 = arith.truncf %51 : vector<8x128xf32> to vector<8x128xbf16>
      %cst_73 = arith.constant dense<0.000000e+00> : vector<8x128xf32>
      %82 = tpu.matmul %81, %74, %cst_73 {dimension_numbers = #tpu.dot_dimension_numbers<[1], [0], [0], [1], [0, 0, 1, 1], [], []>} : vector<8x128xbf16>, vector<128x128xbf16>, vector<8x128xf32> -> vector<8x128xf32>
      %83 = vector.broadcast %76 : vector<1x128xf32> to vector<8x128xf32>
      %84 = arith.addf %82, %83 : vector<8x128xf32>
      %cst_74 = arith.constant 0.000000e+00 : f32
      %85 = vector.broadcast %cst_74 : f32 to vector<8x128xf32>
      %86 = arith.maximumf %84, %85 : vector<8x128xf32>
      %87 = arith.truncf %86 : vector<8x128xf32> to vector<8x128xbf16>
      %cst_75 = arith.constant dense<0.000000e+00> : vector<8x128xf32>
      %88 = tpu.matmul %87, %78, %cst_75 {dimension_numbers = #tpu.dot_dimension_numbers<[1], [0], [0], [1], [0, 0, 1, 1], [], []>} : vector<8x128xbf16>, vector<128x128xbf16>, vector<8x128xf32> -> vector<8x128xf32>
      %89 = vector.broadcast %80 : vector<1x128xf32> to vector<8x128xf32>
      %90 = arith.addf %88, %89 : vector<8x128xf32>
      %91 = arith.addf %90, %51 : vector<8x128xf32>
      %cst_76 = arith.constant 0.000000e+00 : f32
      %92 = vector.broadcast %cst_76 : f32 to vector<8x128xf32>
      %93 = arith.maximumf %91, %92 : vector<8x128xf32>
      %c0_77 = arith.constant 0 : index
      %c0_78 = arith.constant 0 : index
      %94 = vector.load %arg20[%c0_77, %c0_78] : memref<128x128xbf16, #tpu.memory_space<vmem>>, vector<128x128xbf16>
      %95 = arith.truncf %72 : vector<8x128xf32> to vector<8x128xbf16>
      %cst_79 = arith.constant dense<0.000000e+00> : vector<8x128xf32>
      %96 = tpu.matmul %95, %94, %cst_79 {dimension_numbers = #tpu.dot_dimension_numbers<[1], [0], [0], [1], [0, 0, 1, 1], [], []>} : vector<8x128xbf16>, vector<128x128xbf16>, vector<8x128xf32> -> vector<8x128xf32>
      %c0_80 = arith.constant 0 : index
      %c0_81 = arith.constant 0 : index
      %97 = vector.load %arg21[%c0_80, %c0_81] : memref<128x128xbf16, #tpu.memory_space<vmem>>, vector<128x128xbf16>
      %98 = arith.truncf %93 : vector<8x128xf32> to vector<8x128xbf16>
      %cst_82 = arith.constant dense<0.000000e+00> : vector<8x128xf32>
      %99 = tpu.matmul %98, %97, %cst_82 {dimension_numbers = #tpu.dot_dimension_numbers<[1], [0], [0], [1], [0, 0, 1, 1], [], []>} : vector<8x128xbf16>, vector<128x128xbf16>, vector<8x128xf32> -> vector<8x128xf32>
      %100 = arith.addf %96, %99 : vector<8x128xf32>
      %c0_83 = arith.constant 0 : index
      %c0_84 = arith.constant 0 : index
      %101 = vector.load %arg22[%c0_83, %c0_84] : memref<1x128xf32, #tpu.memory_space<vmem>>, vector<1x128xf32>
      %102 = vector.broadcast %101 : vector<1x128xf32> to vector<8x128xf32>
      %103 = arith.addf %100, %102 : vector<8x128xf32>
      %cst_85 = arith.constant 0.000000e+00 : f32
      %104 = vector.broadcast %cst_85 : f32 to vector<8x128xf32>
      %105 = arith.maximumf %103, %104 : vector<8x128xf32>
      %c0_86 = arith.constant 0 : index
      %c0_87 = arith.constant 0 : index
      %c0_88 = arith.constant 0 : index
      %106 = vector.load %arg23[%c0_86, %c0_87, %c0_88] : memref<1x128x128xbf16, #tpu.memory_space<vmem>>, vector<1x128x128xbf16>
      %107 = vector.shape_cast %106 : vector<1x128x128xbf16> to vector<128x128xbf16>
      %c0_89 = arith.constant 0 : index
      %c0_90 = arith.constant 0 : index
      %c0_91 = arith.constant 0 : index
      %108 = vector.load %arg24[%c0_89, %c0_90, %c0_91] : memref<1x1x128xf32, #tpu.memory_space<vmem>>, vector<1x1x128xf32>
      %109 = vector.shape_cast %108 : vector<1x1x128xf32> to vector<1x128xf32>
      %c0_92 = arith.constant 0 : index
      %c0_93 = arith.constant 0 : index
      %c0_94 = arith.constant 0 : index
      %110 = vector.load %arg25[%c0_92, %c0_93, %c0_94] : memref<1x128x128xbf16, #tpu.memory_space<vmem>>, vector<1x128x128xbf16>
      %111 = vector.shape_cast %110 : vector<1x128x128xbf16> to vector<128x128xbf16>
      %c0_95 = arith.constant 0 : index
      %c0_96 = arith.constant 0 : index
      %c0_97 = arith.constant 0 : index
      %112 = vector.load %arg26[%c0_95, %c0_96, %c0_97] : memref<1x1x128xf32, #tpu.memory_space<vmem>>, vector<1x1x128xf32>
      %113 = vector.shape_cast %112 : vector<1x1x128xf32> to vector<1x128xf32>
      %114 = arith.truncf %105 : vector<8x128xf32> to vector<8x128xbf16>
      %cst_98 = arith.constant dense<0.000000e+00> : vector<8x128xf32>
      %115 = tpu.matmul %114, %107, %cst_98 {dimension_numbers = #tpu.dot_dimension_numbers<[1], [0], [0], [1], [0, 0, 1, 1], [], []>} : vector<8x128xbf16>, vector<128x128xbf16>, vector<8x128xf32> -> vector<8x128xf32>
      %116 = vector.broadcast %109 : vector<1x128xf32> to vector<8x128xf32>
      %117 = arith.addf %115, %116 : vector<8x128xf32>
      %cst_99 = arith.constant 0.000000e+00 : f32
      %118 = vector.broadcast %cst_99 : f32 to vector<8x128xf32>
      %119 = arith.maximumf %117, %118 : vector<8x128xf32>
      %120 = arith.truncf %119 : vector<8x128xf32> to vector<8x128xbf16>
      %cst_100 = arith.constant dense<0.000000e+00> : vector<8x128xf32>
      %121 = tpu.matmul %120, %111, %cst_100 {dimension_numbers = #tpu.dot_dimension_numbers<[1], [0], [0], [1], [0, 0, 1, 1], [], []>} : vector<8x128xbf16>, vector<128x128xbf16>, vector<8x128xf32> -> vector<8x128xf32>
      %122 = vector.broadcast %113 : vector<1x128xf32> to vector<8x128xf32>
      %123 = arith.addf %121, %122 : vector<8x128xf32>
      %124 = arith.addf %123, %105 : vector<8x128xf32>
      %cst_101 = arith.constant 0.000000e+00 : f32
      %125 = vector.broadcast %cst_101 : f32 to vector<8x128xf32>
      %126 = arith.maximumf %124, %125 : vector<8x128xf32>
      %c0_102 = arith.constant 0 : index
      %c0_103 = arith.constant 0 : index
      %127 = vector.load %arg27[%c0_102, %c0_103] : memref<128x128xbf16, #tpu.memory_space<vmem>>, vector<128x128xbf16>
      %128 = arith.truncf %126 : vector<8x128xf32> to vector<8x128xbf16>
      %cst_104 = arith.constant dense<0.000000e+00> : vector<8x128xf32>
      %129 = tpu.matmul %128, %127, %cst_104 {dimension_numbers = #tpu.dot_dimension_numbers<[1], [0], [0], [1], [0, 0, 1, 1], [], []>} : vector<8x128xbf16>, vector<128x128xbf16>, vector<8x128xf32> -> vector<8x128xf32>
      %c0_105 = arith.constant 0 : index
      %c0_106 = arith.constant 0 : index
      %130 = vector.load %arg28[%c0_105, %c0_106] : memref<1x128xf32, #tpu.memory_space<vmem>>, vector<1x128xf32>
      %131 = vector.broadcast %130 : vector<1x128xf32> to vector<8x128xf32>
      %132 = arith.addf %129, %131 : vector<8x128xf32>
      %c0_107 = arith.constant 0 : index
      %c0_108 = arith.constant 0 : index
      %133 = vector.load %arg29[%c0_107, %c0_108] : memref<8x128xf32, #tpu.memory_space<vmem>>, vector<8x128xf32>
      tpu.vector_store %arg29[%c0_107, %c0_108], %132 {strides = array<i32>} : memref<8x128xf32, #tpu.memory_space<vmem>>, vector<8x128xf32>,
    } else {
    }
    return
  }
  func.func @transform_0(%arg0: i32, %arg1: i32) -> (i32, i32, i32) {
    %c0_i32 = arith.constant 0 : i32
    %c0_i32_0 = arith.constant 0 : i32
    return %arg0, %arg1, %c0_i32 : i32, i32, i32
  }
  func.func @transform_1(%arg0: i32, %arg1: i32) -> (i32, i32, i32) {
    %c0_i32 = arith.constant 0 : i32
    %c0_i32_0 = arith.constant 0 : i32
    return %arg0, %arg1, %c0_i32 : i32, i32, i32
  }
  func.func @transform_2(%arg0: i32, %arg1: i32) -> (i32, i32) {
    %c0_i32 = arith.constant 0 : i32
    %c0_i32_0 = arith.constant 0 : i32
    %c0_i32_1 = arith.constant 0 : i32
    return %c0_i32, %c0_i32_0 : i32, i32
  }
  func.func @transform_3(%arg0: i32, %arg1: i32) -> (i32, i32) {
    %c0_i32 = arith.constant 0 : i32
    %c0_i32_0 = arith.constant 0 : i32
    %c0_i32_1 = arith.constant 0 : i32
    return %c0_i32, %c0_i32_0 : i32, i32
  }
  func.func @transform_4(%arg0: i32, %arg1: i32) -> (i32, i32) {
    %c0_i32 = arith.constant 0 : i32
    %c0_i32_0 = arith.constant 0 : i32
    %c0_i32_1 = arith.constant 0 : i32
    return %c0_i32, %c0_i32_0 : i32, i32
  }
  func.func @transform_5(%arg0: i32, %arg1: i32) -> (i32, i32) {
    %c0_i32 = arith.constant 0 : i32
    %c0_i32_0 = arith.constant 0 : i32
    %c0_i32_1 = arith.constant 0 : i32
    return %c0_i32, %c0_i32_0 : i32, i32
  }
  func.func @transform_6(%arg0: i32, %arg1: i32) -> (i32, i32) {
    %c0_i32 = arith.constant 0 : i32
    %c0_i32_0 = arith.constant 0 : i32
    %c0_i32_1 = arith.constant 0 : i32
    return %c0_i32, %c0_i32_0 : i32, i32
  }
  func.func @transform_7(%arg0: i32, %arg1: i32) -> (i32, i32) {
    %c0_i32 = arith.constant 0 : i32
    %c0_i32_0 = arith.constant 0 : i32
    %c0_i32_1 = arith.constant 0 : i32
    return %c0_i32, %c0_i32_0 : i32, i32
  }
  func.func @transform_8(%arg0: i32, %arg1: i32) -> (i32, i32) {
    %c0_i32 = arith.constant 0 : i32
    %c0_i32_0 = arith.constant 0 : i32
    %c0_i32_1 = arith.constant 0 : i32
    return %c0_i32, %c0_i32_0 : i32, i32
  }
  func.func @transform_9(%arg0: i32, %arg1: i32) -> (i32, i32) {
    %c0_i32 = arith.constant 0 : i32
    %c0_i32_0 = arith.constant 0 : i32
    %c0_i32_1 = arith.constant 0 : i32
    return %c0_i32, %c0_i32_0 : i32, i32
  }
  func.func @transform_10(%arg0: i32, %arg1: i32) -> (i32, i32, i32) {
    %c0_i32 = arith.constant 0 : i32
    %c0_i32_0 = arith.constant 0 : i32
    %c0_i32_1 = arith.constant 0 : i32
    %c0_i32_2 = arith.constant 0 : i32
    return %c0_i32, %c0_i32_0, %c0_i32_1 : i32, i32, i32
  }
  func.func @transform_11(%arg0: i32, %arg1: i32) -> (i32, i32, i32) {
    %c0_i32 = arith.constant 0 : i32
    %c0_i32_0 = arith.constant 0 : i32
    %c0_i32_1 = arith.constant 0 : i32
    %c0_i32_2 = arith.constant 0 : i32
    return %c0_i32, %c0_i32_0, %c0_i32_1 : i32, i32, i32
  }
  func.func @transform_12(%arg0: i32, %arg1: i32) -> (i32, i32, i32) {
    %c0_i32 = arith.constant 0 : i32
    %c0_i32_0 = arith.constant 0 : i32
    %c0_i32_1 = arith.constant 0 : i32
    %c0_i32_2 = arith.constant 0 : i32
    return %c0_i32, %c0_i32_0, %c0_i32_1 : i32, i32, i32
  }
  func.func @transform_13(%arg0: i32, %arg1: i32) -> (i32, i32, i32) {
    %c0_i32 = arith.constant 0 : i32
    %c0_i32_0 = arith.constant 0 : i32
    %c0_i32_1 = arith.constant 0 : i32
    %c0_i32_2 = arith.constant 0 : i32
    return %c0_i32, %c0_i32_0, %c0_i32_1 : i32, i32, i32
  }
  func.func @transform_14(%arg0: i32, %arg1: i32) -> (i32, i32, i32) {
    %c0_i32 = arith.constant 0 : i32
    %c0_i32_0 = arith.constant 0 : i32
    %c0_i32_1 = arith.constant 0 : i32
    %c0_i32_2 = arith.constant 0 : i32
    return %c0_i32, %c0_i32_0, %c0_i32_1 : i32, i32, i32
  }
  func.func @transform_15(%arg0: i32, %arg1: i32) -> (i32, i32, i32) {
    %c0_i32 = arith.constant 0 : i32
    %c0_i32_0 = arith.constant 0 : i32
    %c0_i32_1 = arith.constant 0 : i32
    %c0_i32_2 = arith.constant 0 : i32
    return %c0_i32, %c0_i32_0, %c0_i32_1 : i32, i32, i32
  }
  func.func @transform_16(%arg0: i32, %arg1: i32) -> (i32, i32, i32) {
    %c0_i32 = arith.constant 0 : i32
    %c0_i32_0 = arith.constant 0 : i32
    %c0_i32_1 = arith.constant 0 : i32
    %c0_i32_2 = arith.constant 0 : i32
    return %c0_i32, %c0_i32_0, %c0_i32_1 : i32, i32, i32
  }
  func.func @transform_17(%arg0: i32, %arg1: i32) -> (i32, i32, i32) {
    %c0_i32 = arith.constant 0 : i32
    %c0_i32_0 = arith.constant 0 : i32
    %c0_i32_1 = arith.constant 0 : i32
    %c0_i32_2 = arith.constant 0 : i32
    return %c0_i32, %c0_i32_0, %c0_i32_1 : i32, i32, i32
  }
  func.func @transform_18(%arg0: i32, %arg1: i32) -> (i32, i32) {
    %c0_i32 = arith.constant 0 : i32
    %c0_i32_0 = arith.constant 0 : i32
    %c0_i32_1 = arith.constant 0 : i32
    return %c0_i32, %c0_i32_0 : i32, i32
  }
  func.func @transform_19(%arg0: i32, %arg1: i32) -> (i32, i32) {
    %c0_i32 = arith.constant 0 : i32
    %c0_i32_0 = arith.constant 0 : i32
    %c0_i32_1 = arith.constant 0 : i32
    return %c0_i32, %c0_i32_0 : i32, i32
  }
  func.func @transform_20(%arg0: i32, %arg1: i32) -> (i32, i32) {
    %c0_i32 = arith.constant 0 : i32
    %c0_i32_0 = arith.constant 0 : i32
    %c0_i32_1 = arith.constant 0 : i32
    return %c0_i32, %c0_i32_0 : i32, i32
  }
  func.func @transform_21(%arg0: i32, %arg1: i32) -> (i32, i32, i32) {
    %c0_i32 = arith.constant 0 : i32
    %c0_i32_0 = arith.constant 0 : i32
    %c0_i32_1 = arith.constant 0 : i32
    %c0_i32_2 = arith.constant 0 : i32
    return %c0_i32, %c0_i32_0, %c0_i32_1 : i32, i32, i32
  }
  func.func @transform_22(%arg0: i32, %arg1: i32) -> (i32, i32, i32) {
    %c0_i32 = arith.constant 0 : i32
    %c0_i32_0 = arith.constant 0 : i32
    %c0_i32_1 = arith.constant 0 : i32
    %c0_i32_2 = arith.constant 0 : i32
    return %c0_i32, %c0_i32_0, %c0_i32_1 : i32, i32, i32
  }
  func.func @transform_23(%arg0: i32, %arg1: i32) -> (i32, i32, i32) {
    %c0_i32 = arith.constant 0 : i32
    %c0_i32_0 = arith.constant 0 : i32
    %c0_i32_1 = arith.constant 0 : i32
    %c0_i32_2 = arith.constant 0 : i32
    return %c0_i32, %c0_i32_0, %c0_i32_1 : i32, i32, i32
  }
  func.func @transform_24(%arg0: i32, %arg1: i32) -> (i32, i32, i32) {
    %c0_i32 = arith.constant 0 : i32
    %c0_i32_0 = arith.constant 0 : i32
    %c0_i32_1 = arith.constant 0 : i32
    %c0_i32_2 = arith.constant 0 : i32
    return %c0_i32, %c0_i32_0, %c0_i32_1 : i32, i32, i32
  }
  func.func @transform_25(%arg0: i32, %arg1: i32) -> (i32, i32) {
    %c0_i32 = arith.constant 0 : i32
    %c0_i32_0 = arith.constant 0 : i32
    %c0_i32_1 = arith.constant 0 : i32
    return %c0_i32, %c0_i32_0 : i32, i32
  }
  func.func @transform_26(%arg0: i32, %arg1: i32) -> (i32, i32) {
    %c0_i32 = arith.constant 0 : i32
    %c0_i32_0 = arith.constant 0 : i32
    %c0_i32_1 = arith.constant 0 : i32
    return %c0_i32, %c0_i32_0 : i32, i32
  }
  func.func @transform_27(%arg0: i32, %arg1: i32) -> (i32, i32) {
    %c0_i32 = arith.constant 0 : i32
    %c0_i32_0 = arith.constant 0 : i32
    return %arg0, %c0_i32 : i32, i32
  }
}

</mosaic_0001>

<bundles_post_ra>
// kernel: early_concat_alternate_forward.1
= control target key start
LH: loop header
LB: loop body
LE: loop exit
PB: predicated region body
PF: predicated region fallthrough
CT: control target
= control target key end

     0   :  { %v2663_v33 = vmov 0.0   ;;  %vm2664_vm0 = vmmov 0   ;;  %vm406_vm1 = vcmask 1041409   ;;  %vm408_vm2 = vcmask 1042434   ;;  %s3382_s2 = inlined_call_operand.vmem [shape: bf16[128,128], index: 2, kind: input, shape index: {}]   ;;  %s3383_s4 = inlined_call_operand.vmem [shape: bf16[128,128], index: 4, kind: input, shape index: {}]   ;;  %s3384_s0 = inlined_call_operand.vmem [shape: bf16[8,16,128], index: 0, kind: input, shape index: {}]   ;;  %s3385_s1 = inlined_call_operand.vmem [shape: bf16[8,16,128], index: 1, kind: input, shape index: {}]   ;;  %s3386_s6 = inlined_call_operand.vmem [shape: bf16[128,128], index: 6, kind: input, shape index: {}]   ;;  %s3387_s8 = inlined_call_operand.vmem [shape: bf16[128,128], index: 8, kind: input, shape index: {}]   ;;  %s3388_s10 = inlined_call_operand.vmem [shape: bf16[1,128,128], index: 10, kind: input, shape index: {}]   ;;  %s3389_s5 = inlined_call_operand.vmem [shape: f32[1,128], index: 5, kind: input, shape index: {}]   ;;  %s3390_s3 = inlined_call_operand.vmem [shape: f32[1,128], index: 3, kind: input, shape index: {}]   ;;  %s3391_s14 = inlined_call_operand.vmem [shape: bf16[1,128,128], index: 14, kind: input, shape index: {}]   ;;  %s3392_s12 = inlined_call_operand.vmem [shape: bf16[1,128,128], index: 12, kind: input, shape index: {}]   ;;  %s3393_s7 = inlined_call_operand.vmem [shape: f32[1,128], index: 7, kind: input, shape index: {}]   ;;  %s3394_s9 = inlined_call_operand.vmem [shape: f32[1,128], index: 9, kind: input, shape index: {}]   ;;  %s3395_s16 = inlined_call_operand.vmem [shape: bf16[1,128,128], index: 16, kind: input, shape index: {}]   ;;  %s3396_s18 = inlined_call_operand.vmem [shape: bf16[128,128], index: 18, kind: input, shape index: {}]   ;;  %s3397_s11 = inlined_call_operand.vmem [shape: f32[1,1,128], index: 11, kind: input, shape index: {}]   ;;  %s3398_s15 = inlined_call_operand.vmem [shape: f32[1,1,128], index: 15, kind: input, shape index: {}]   ;;  %s3399_s19 = inlined_call_operand.vmem [shape: bf16[128,128], index: 19, kind: input, shape index: {}]   ;;  %s3400_s13 = inlined_call_operand.vmem [shape: f32[1,1,128], index: 13, kind: input, shape index: {}]   ;;  %s3401_s17 = inlined_call_operand.vmem [shape: f32[1,1,128], index: 17, kind: input, shape index: {}]   ;;  %s3402_s21 = inlined_call_operand.vmem [shape: bf16[1,128,128], index: 21, kind: input, shape index: {}]   ;;  %s3403_s23 = inlined_call_operand.vmem [shape: bf16[1,128,128], index: 23, kind: input, shape index: {}]   ;;  %s3404_s20 = inlined_call_operand.vmem [shape: f32[1,128], index: 20, kind: input, shape index: {}]   ;;  %s3405_s25 = inlined_call_operand.vmem [shape: bf16[128,128], index: 25, kind: input, shape index: {}]   ;;  %s3406_s22 = inlined_call_operand.vmem [shape: f32[1,1,128], index: 22, kind: input, shape index: {}]   ;;  %s3407_s24 = inlined_call_operand.vmem [shape: f32[1,1,128], index: 24, kind: input, shape index: {}]   ;;  %s3408_s26 = inlined_call_operand.vmem [shape: f32[1,128], index: 26, kind: input, shape index: {}]   ;;  %s3409_s27 = inlined_call_operand.vmem [shape: f32[8,128], index: 27, kind: output, shape index: {}]  }
   0x1   :  { %3419 = sst [smem:[#allocation4_spill]] %s3382_s2  ;;  %vm410_vm3 = vcmask 1043459   ;;  %vm412_vm4 = vcmask 1044484   ;;  %vm414_vm5 = vcmask 1045509   ;;  %vm416_vm6 = vcmask 1046534  }
   0x2   :  { %3420 = sst [smem:[#allocation5_spill]] %s3383_s4  ;;  %vm418_vm7 = vcmask 1047559  }
   0x3   :  { %3421 = sst [smem:[#allocation6_spill]] %s3384_s0 }
   0x4   :  { %3422 = sst [smem:[#allocation7_spill]] %s3385_s1 }
   0x5   :  { %3423 = sst [smem:[#allocation8_spill]] %s3386_s6 }
   0x6   :  { %3424 = sst [smem:[#allocation9_spill]] %s3387_s8 }
   0x7   :  { %3425 = sst [smem:[#allocation10_spill]] %s3388_s10 }
   0x8   :  { %3426 = sst [smem:[#allocation11_spill]] %s3389_s5 }
   0x9   :  { %3427 = sst [smem:[#allocation12_spill]] %s3390_s3 }
   0xa   :  { %3428 = sst [smem:[#allocation13_spill]] %s3391_s14 }
   0xb   :  { %3429 = sst [smem:[#allocation14_spill]] %s3392_s12 }
   0xc   :  { %3430 = sst [smem:[#allocation15_spill]] %s3393_s7 }
   0xd   :  { %3431 = sst [smem:[#allocation16_spill]] %s3404_s20 }
   0xe   :  { %s3432_s6 = sld [smem:[#allocation4_spill]] }
   0xf   :  { %s3433_s20 = sld [smem:[#allocation5_spill]] }
  0x10   :  { %s3434_s0 = sld [smem:[#allocation6_spill]] }
  0x11   :  { %s3435_s5 = sld [smem:[#allocation7_spill]] }
  0x12   :  { %s3436_s4 = sld [smem:[#allocation8_spill]] }
  0x13   :  { %s3440_s1 = sld [smem:[#allocation10_spill]] }
  0x14   :  { %v2543_v0 = vld [vmem:[%s3432_s6 + $0x38] sm:$0xff]   ;;  %v2545_v2 = vld [vmem:[%s3432_s6 + $0x30] sm:$0xff]   ;;  %v2547_v4 = vld [vmem:[%s3432_s6 + $0x28] sm:$0xff]   ;;  %s3441_s29 = sld [smem:[#allocation14_spill]] }
  0x15   :  { %v2544_v1 = vld [vmem:[%s3433_s20 + $0x38] sm:$0xff]   ;;  %2257 = vmatprep.subr.bf16.mxu0 %v2543_v0  ;;  %v2546_v3 = vld [vmem:[%s3433_s20 + $0x30] sm:$0xff]   ;;  %v2548_v5 = vld [vmem:[%s3433_s20 + $0x28] sm:$0xff]   ;;  %s3442_s12 = sld [smem:[#allocation15_spill]] }
  0x16   :  { %2289 = vmatprep.subr.bf16.mxu1 %v2544_v1  ;;  %2258 = vmatpush3.bf16.msra.mxu0 %v2543_v0  ;;  %v2549_v6 = vld [vmem:[%s3432_s6 + $0x20] sm:$0xff]   ;;  %v2551_v8 = vld [vmem:[%s3432_s6 + $0x18] sm:$0xff]   ;;  %v2553_v10 = vld [vmem:[%s3432_s6 + $0x10] sm:$0xff]   ;;  %s3443_s7 = sld [smem:[#allocation13_spill]] }
  0x17   :  { %2290 = vmatpush3.bf16.msra.mxu1 %v2544_v1  ;;  %2259 = vmatprep.subr.bf16.mxu0 %v2545_v2  ;;  %v2550_v7 = vld [vmem:[%s3433_s20 + $0x20] sm:$0xff]   ;;  %v2552_v9 = vld [vmem:[%s3433_s20 + $0x18] sm:$0xff]   ;;  %v2554_v11 = vld [vmem:[%s3433_s20 + $0x10] sm:$0xff]   ;;  %s3444_s30 = sld [smem:[#allocation16_spill]] }
  0x18   :  { %2291 = vmatprep.subr.bf16.mxu1 %v2546_v3  ;;  %v2559_v12 = vld [vmem:[%s3434_s0] sm:$0xff]   ;;  %v2555_v14 = vld [vmem:[%s3432_s6 + $0x8] sm:$0xff]   ;;  %v2563_v20 = vld [vmem:[%s3434_s0 + $0x10] sm:$0xff]  }
  0x19   :  { %v2560_v13 = vld [vmem:[%s3435_s5] sm:$0xff]   ;;  %2273 = vmatprep.mubr.bf16.mxu0 %v2559_v12  ;;  %v2556_v15 = vld [vmem:[%s3433_s20 + $0x8] sm:$0xff]   ;;  %v2564_v21 = vld [vmem:[%s3435_s5 + $0x10] sm:$0xff]  }
  0x1a   :  { %2260 = vmatpush3.bf16.msra.mxu0 %v2545_v2  ;;  %2305 = vmatprep.mubr.bf16.mxu1 %v2560_v13  ;;  %v2557_v16 = vld [vmem:[%s3432_s6] sm:$0xff]   ;;  %v2561_v18 = vld [vmem:[%s3434_s0 + $0x8] sm:$0xff]   ;;  %v2565_v22 = vld [vmem:[%s3434_s0 + $0x18] sm:$0xff]   ;;  %s3437_s6 = sld [smem:[#allocation9_spill]] }
  0x1b   :  { %2292 = vmatpush3.bf16.msra.mxu1 %v2546_v3  ;;  %2261 = vmatprep.subr.bf16.mxu0 %v2547_v4  ;;  %v2558_v17 = vld [vmem:[%s3433_s20] sm:$0xff]   ;;  %v2562_v19 = vld [vmem:[%s3435_s5 + $0x8] sm:$0xff]   ;;  %v2566_v23 = vld [vmem:[%s3435_s5 + $0x18] sm:$0xff]   ;;  %s3439_s20 = sld [smem:[#allocation12_spill]] }
  0x1c   :  { %2293 = vmatprep.subr.bf16.mxu1 %v2548_v5  ;;  %v2567_v24 = vld [vmem:[%s3434_s0 + $0x20] sm:$0xff]   ;;  %v2569_v26 = vld [vmem:[%s3434_s0 + $0x28] sm:$0xff]   ;;  %v2571_v28 = vld [vmem:[%s3434_s0 + $0x30] sm:$0xff]  }
  0x1d   :  { %v2568_v25 = vld [vmem:[%s3435_s5 + $0x20] sm:$0xff]   ;;  %v2570_v27 = vld [vmem:[%s3435_s5 + $0x28] sm:$0xff]   ;;  %v2572_v29 = vld [vmem:[%s3435_s5 + $0x30] sm:$0xff]  }
  0x1e   :  { %2262 = vmatpush3.bf16.msra.mxu0 %v2547_v4  ;;  %v2573_v30 = vld [vmem:[%s3434_s0 + $0x38] sm:$0xff]   ;;  %v2577_v35 = vld [vmem:[%s3436_s4 + $0x30] sm:$0xff]   ;;  %v2579_v37 = vld [vmem:[%s3436_s4 + $0x28] sm:$0xff]  }
  0x1f   :  { %2294 = vmatpush3.bf16.msra.mxu1 %v2548_v5  ;;  %2263 = vmatprep.subr.bf16.mxu0 %v2549_v6  ;;  %v2574_v31 = vld [vmem:[%s3435_s5 + $0x38] sm:$0xff]   ;;  %v2581_v39 = vld [vmem:[%s3436_s4 + $0x20] sm:$0xff]   ;;  %v2585_v43 = vld [vmem:[%s3436_s4 + $0x10] sm:$0xff]   ;;  %s3438_s5 = sld [smem:[#allocation11_spill]] }
  0x20   :  { %2295 = vmatprep.subr.bf16.mxu1 %v2550_v7  ;;  %v2575_v32 = vld [vmem:[%s3436_s4 + $0x38] sm:$0xff]   ;;  %v2578_v36 = vld [vmem:[%s3437_s6 + $0x30] sm:$0xff]   ;;  %v2580_v38 = vld [vmem:[%s3437_s6 + $0x28] sm:$0xff]  }
  0x21   :  { %v2576_v34 = vld [vmem:[%s3437_s6 + $0x38] sm:$0xff]   ;;  %v2582_v40 = vld [vmem:[%s3437_s6 + $0x20] sm:$0xff]   ;;  %v2586_v44 = vld [vmem:[%s3437_s6 + $0x10] sm:$0xff]  }
  0x22   :  { %2264 = vmatpush3.bf16.msra.mxu0 %v2549_v6  ;;  %v2583_v41 = vld [vmem:[%s3436_s4 + $0x18] sm:$0xff]   ;;  %v2587_v45 = vld [vmem:[%s3436_s4 + $0x8] sm:$0xff]   ;;  %v2589_v47 = vld [vmem:[%s3436_s4] sm:$0xff]  }
  0x23   :  { %2296 = vmatpush3.bf16.msra.mxu1 %v2550_v7  ;;  %2265 = vmatprep.subr.bf16.mxu0 %v2551_v8  ;;  %v2584_v42 = vld [vmem:[%s3437_s6 + $0x18] sm:$0xff]   ;;  %v2588_v46 = vld [vmem:[%s3437_s6 + $0x8] sm:$0xff]   ;;  %v2590_v48 = vld [vmem:[%s3437_s6] sm:$0xff]  }
  0x24   :  { %2297 = vmatprep.subr.bf16.mxu1 %v2552_v9  ;;  %v2979_v51 = vld [vmem:[%s3439_s20] ss:$0 sm:$0xff] }
  0x25   :  { %v2974_v49 = vld [vmem:[%s3438_s5] ss:$0 sm:$0xff] }
  0x26   :  { %2266 = vmatpush3.bf16.msra.mxu0 %v2551_v8 }
  0x27   :  { %2298 = vmatpush3.bf16.msra.mxu1 %v2552_v9  ;;  %2267 = vmatprep.subr.bf16.mxu0 %v2553_v10 }
  0x28   :  { %2299 = vmatprep.subr.bf16.mxu1 %v2554_v11 }
  0x2a   :  { %2268 = vmatpush3.bf16.msra.mxu0 %v2553_v10 }
  0x2b   :  { %2300 = vmatpush3.bf16.msra.mxu1 %v2554_v11  ;;  %2269 = vmatprep.subr.bf16.mxu0 %v2555_v14 }
  0x2c   :  { %2301 = vmatprep.subr.bf16.mxu1 %v2556_v15 }
  0x2e   :  { %2270 = vmatpush3.bf16.msra.mxu0 %v2555_v14 }
  0x2f   :  { %2302 = vmatpush3.bf16.msra.mxu1 %v2556_v15  ;;  %2271 = vmatprep.subr.bf16.mxu0 %v2557_v16 }
  0x30   :  { %2303 = vmatprep.subr.bf16.mxu1 %v2558_v17 }
  0x32   :  { %2272 = vmatpush3.bf16.msra.mxu0 %v2557_v16 }
  0x33   :  { %2304 = vmatpush3.bf16.msra.mxu1 %v2558_v17  ;;  %2321 = vmatprep.subr.bf16.mxu0 %v2663_v33 }
  0x34   :  { %2341 = vmatprep.subr.bf16.mxu1 %v2663_v33 }
  0x35   :  { %2274 = vmatmul.mubr.bf16.vlgmr.msra.gmra.mxu0 %v2561_v18 }
  0x36   :  { %2306 = vmatmul.mubr.bf16.vlgmr.msra.gmra.mxu1 %v2562_v19  ;;  %2277 = vmatprep.mubr.bf16.mxu0 %v2563_v20 }
  0x37   :  { %2309 = vmatprep.mubr.bf16.mxu1 %v2564_v21  ;;  %2322 = vmatpush3.bf16.msra.mxu0 %v2575_v32 }
  0x38   :  { %2342 = vmatpush3.bf16.msra.mxu1 %v2576_v34  ;;  %2323 = vmatprep.subr.bf16.mxu0 %v2663_v33 }
  0x39   :  { %2343 = vmatprep.subr.bf16.mxu1 %v2663_v33 }
  0x3b   :  { %2324 = vmatpush3.bf16.msra.mxu0 %v2577_v35 }
  0x3c   :  { %2344 = vmatpush3.bf16.msra.mxu1 %v2578_v36  ;;  %2325 = vmatprep.subr.bf16.mxu0 %v2663_v33 }
  0x3d   :  { %2278 = vmatmul.mubr.bf16.gmra.mxu0 %v2565_v22  ;;  %2345 = vmatprep.subr.bf16.mxu1 %v2663_v33 }
  0x3e   :  { %2310 = vmatmul.mubr.bf16.gmra.mxu1 %v2566_v23  ;;  %2281 = vmatprep.mubr.bf16.mxu0 %v2567_v24 }
  0x3f   :  { %2313 = vmatprep.mubr.bf16.mxu1 %v2568_v25  ;;  %2326 = vmatpush3.bf16.msra.mxu0 %v2579_v37 }
  0x40   :  { %2346 = vmatpush3.bf16.msra.mxu1 %v2580_v38  ;;  %2327 = vmatprep.subr.bf16.mxu0 %v2663_v33 }
  0x41   :  { %2347 = vmatprep.subr.bf16.mxu1 %v2663_v33 }
  0x43   :  { %2328 = vmatpush3.bf16.msra.mxu0 %v2581_v39 }
  0x44   :  { %2348 = vmatpush3.bf16.msra.mxu1 %v2582_v40  ;;  %2329 = vmatprep.subr.bf16.mxu0 %v2663_v33 }
  0x45   :  { %2282 = vmatmul.mubr.bf16.gmra.mxu0 %v2569_v26  ;;  %2349 = vmatprep.subr.bf16.mxu1 %v2663_v33 }
  0x46   :  { %2314 = vmatmul.mubr.bf16.gmra.mxu1 %v2570_v27  ;;  %2285 = vmatprep.mubr.bf16.mxu0 %v2571_v28 }
  0x47   :  { %2317 = vmatprep.mubr.bf16.mxu1 %v2572_v29  ;;  %2330 = vmatpush3.bf16.msra.mxu0 %v2583_v41 }
  0x48   :  { %2350 = vmatpush3.bf16.msra.mxu1 %v2584_v42  ;;  %2331 = vmatprep.subr.bf16.mxu0 %v2663_v33 }
  0x49   :  { %2351 = vmatprep.subr.bf16.mxu1 %v2663_v33 }
  0x4b   :  { %2332 = vmatpush3.bf16.msra.mxu0 %v2585_v43 }
  0x4c   :  { %2352 = vmatpush3.bf16.msra.mxu1 %v2586_v44  ;;  %2333 = vmatprep.subr.bf16.mxu0 %v2663_v33 }
  0x4d   :  { %2286 = vmatmul.mubr.bf16.gmra.mxu0 %v2573_v30  ;;  %2353 = vmatprep.subr.bf16.mxu1 %v2663_v33 }
  0x4e   :  { %2318 = vmatmul.mubr.bf16.gmra.mxu1 %v2574_v31  ;;  %2337 = vmatprep.mubr.msk.bf16.mxu0 %vm2664_vm0, %v2663_v33 }
  0x4f   :  { %2334 = vmatpush3.bf16.msra.mxu0 %v2587_v45  ;;  %2357 = vmatprep.mubr.msk.bf16.mxu1 %vm2664_vm0, %v2663_v33 }
  0x50   :  { %2354 = vmatpush3.bf16.msra.mxu1 %v2588_v46  ;;  %2335 = vmatprep.subr.bf16.mxu0 %v2663_v33 }
  0x51   :  { %2355 = vmatprep.subr.bf16.mxu1 %v2663_v33 }
  0x53   :  { %2336 = vmatpush3.bf16.msra.mxu0 %v2589_v47 }
  0x54   :  { %2356 = vmatpush3.bf16.msra.mxu1 %v2590_v48  ;;  %2361 = vmatprep.subr.bf16.mxu0 %v2663_v33 }
  0x55   :  { %2381 = vmatprep.subr.bf16.mxu1 %v2663_v33 }
  0xf5   :  { %v2275_v50 = vpop.f32.mrf.mxu0 }
  0xf6   :  { %v2307_v52 = vpop.f32.mrf.mxu1  ;;  %v271_v55 = vadd.f32 %v2275_v50, %v2979_v51 }
  0xf7   :  { %v601_v53 = vadd.f32 %v2307_v52, %v2974_v49  ;;  %v262_v54 = vpop.f32.mrf.mxu0 }
  0xf8   :  { %v592_v56 = vpop.f32.mrf.mxu1  ;;  %v263_v59 = vadd.f32 %v2979_v51, %v262_v54  ;;  %v327_v1 = vmax.f32 %v271_v55, 0.0 }
  0xf9   :  { %v593_v57 = vadd.f32 %v2974_v49, %v592_v56  ;;  %v2276_v58 = vpop.f32.mrf.mxu0  ;;  %v657_v62 = vmax.f32 %v601_v53, 0.0 }
  0xfa   :  { %v274_v60 = vadd.f32 %v2276_v58, %v2979_v51  ;;  %v2308_v61 = vpop.f32.mrf.mxu1  ;;  %v325_v9 = vmax.f32 %v263_v59, 0.0 }
  0xfb   :  { %v604_v63 = vadd.f32 %v2308_v61, %v2974_v49  ;;  %v265_v0 = vpop.f32.mrf.mxu0  ;;  %v655_v5 = vmax.f32 %v593_v57, 0.0 }
  0xfc   :  { %v328_v2 = vmax.f32 %v274_v60, 0.0  ;;  %v266_v3 = vadd.f32 %v2979_v51, %v265_v0  ;;  %v595_v4 = vpop.f32.mrf.mxu1 }
  0xfd   :  { %v658_v6 = vmax.f32 %v604_v63, 0.0  ;;  %v596_v7 = vadd.f32 %v2974_v49, %v595_v4  ;;  %v2279_v8 = vpop.f32.mrf.mxu0 }
  0xfe   :  { %v349_v10 = vmax.f32 %v327_v1, %v328_v2  ;;  %v326_v11 = vmax.f32 %v266_v3, 0.0  ;;  %v287_v12 = vadd.f32 %v2279_v8, %v2979_v51  ;;  %v2311_v13 = vpop.f32.mrf.mxu1 }
  0xff   :  { %v679_v14 = vmax.f32 %v657_v62, %v658_v6  ;;  %v656_v15 = vmax.f32 %v596_v7, 0.0  ;;  %v617_v16 = vadd.f32 %v2311_v13, %v2974_v49  ;;  %v278_v17 = vpop.f32.mrf.mxu0 }
 0x100   :  { %v350_v18 = vrot.slane %v349_v10, 4  ;;  %v342_v19 = vmax.f32 %v325_v9, %v326_v11  ;;  %v331_v20 = vmax.f32 %v287_v12, 0.0  ;;  %v608_v21 = vpop.f32.mrf.mxu1  ;;  %v279_v24 = vadd.f32 %v2979_v51, %v278_v17 }
 0x101   :  { %v680_v22 = vrot.slane %v679_v14, 4  ;;  %v672_v23 = vmax.f32 %v655_v5, %v656_v15  ;;  %v609_v25 = vadd.f32 %v2974_v49, %v608_v21  ;;  %v2280_v26 = vpop.f32.mrf.mxu0  ;;  %v661_v29 = vmax.f32 %v617_v16, 0.0 }
 0x102   :  { %v351_v27 = vmax.f32 %v349_v10, %v350_v18  ;;  %v343_v28 = vrot.slane %v342_v19, 4  ;;  %v290_v30 = vadd.f32 %v2280_v26, %v2979_v51  ;;  %v2312_v31 = vpop.f32.mrf.mxu1  ;;  %v329_v50 = vmax.f32 %v279_v24, 0.0 }
 0x103   :  { %v681_v32 = vmax.f32 %v679_v14, %v680_v22  ;;  %v673_v34 = vrot.slane %v672_v23, 4  ;;  %v659_v35 = vmax.f32 %v609_v25, 0.0  ;;  %v620_v36 = vadd.f32 %v2312_v31, %v2974_v49  ;;  %v281_v37 = vpop.f32.mrf.mxu0 }
 0x104   :  { %v352_v38 = vrot.slane %v351_v27, 2  ;;  %v344_v39 = vmax.f32 %v342_v19, %v343_v28  ;;  %v332_v40 = vmax.f32 %v290_v30, 0.0  ;;  %v282_v41 = vadd.f32 %v2979_v51, %v281_v37  ;;  %v611_v42 = vpop.f32.mrf.mxu1 }
 0x105   :  { %v682_v43 = vrot.slane %v681_v32, 2  ;;  %v674_v44 = vmax.f32 %v672_v23, %v673_v34  ;;  %v662_v45 = vmax.f32 %v620_v36, 0.0  ;;  %v612_v46 = vadd.f32 %v2974_v49, %v611_v42  ;;  %v2283_v47 = vpop.f32.mrf.mxu0 }
 0x106   :  { %v345_v48 = vrot.slane %v344_v39, 2  ;;  %v363_v52 = vmax.f32 %v331_v20, %v332_v40  ;;  %v330_v53 = vmax.f32 %v282_v41, 0.0  ;;  %v2315_v54 = vpop.f32.mrf.mxu1  ;;  %v353_v59 = vmax.f32 %v351_v27, %v352_v38 }
 0x107   :  { %v675_v55 = vrot.slane %v674_v44, 2  ;;  %v693_v56 = vmax.f32 %v661_v29, %v662_v45  ;;  %v660_v57 = vmax.f32 %v612_v46, 0.0  ;;  %v294_v58 = vpop.f32.mrf.mxu0  ;;  %v683_v60 = vmax.f32 %v681_v32, %v682_v43 }
 0x108   :  { %v356_v61 = vmax.f32 %v329_v50, %v330_v53  ;;  %v624_v62 = vpop.f32.mrf.mxu1  ;;  %v364_v63 = vrot.slane %v363_v52, 4  ;;  %v346_v3 = vmax.f32 %v344_v39, %v345_v48  ;;  %v354_v10 = vrot.slane %v353_v59, 1 }
 0x109   :  { %v694_v0 = vrot.slane %v693_v56, 4  ;;  %v686_v1 = vmax.f32 %v659_v35, %v660_v57  ;;  %v2284_v2 = vpop.f32.mrf.mxu0  ;;  %v676_v4 = vmax.f32 %v674_v44, %v675_v55  ;;  %v684_v11 = vrot.slane %v683_v60, 1 }
 0x10a   :  { %v357_v5 = vrot.slane %v356_v61, 4  ;;  %v2316_v6 = vpop.f32.mrf.mxu1  ;;  %v365_v14 = vmax.f32 %v363_v52, %v364_v63  ;;  %v633_v16 = vadd.f32 %v2315_v54, %v2974_v49  ;;  %v347_v17 = vrot.slane %v346_v3, 1 }
 0x10b   :  { %v695_v7 = vmax.f32 %v693_v56, %v694_v0  ;;  %v687_v8 = vrot.slane %v686_v1, 4  ;;  %v297_v9 = vpop.f32.mrf.mxu0  ;;  %v677_v18 = vrot.slane %v676_v4, 1  ;;  %v303_v19 = vadd.f32 %v2283_v47, %v2979_v51 }
 0x10c   :  { %v358_v12 = vmax.f32 %v356_v61, %v357_v5  ;;  %v627_v13 = vpop.f32.mrf.mxu1  ;;  %v2999_v24 = vmax.f32 %v353_v59, %v354_v10  ;;  %v685_v25 = vmax.f32 %v683_v60, %v684_v11  ;;  %v625_v27 = vadd.f32 %v2974_v49, %v624_v62 }
 0x10d   :  { %v688_v15 = vmax.f32 %v686_v1, %v687_v8  ;;  %v2287_v20 = vpop.f32.mrf.mxu0  ;;  %v696_v22 = vrot.slane %v695_v7, 2  ;;  %v366_v28 = vrot.slane %v365_v14, 2  ;;  %v665_v29 = vmax.f32 %v633_v16, 0.0 }
 0x10e   :  { %v2319_v21 = vpop.f32.mrf.mxu1  ;;  %v359_v26 = vrot.slane %v358_v12, 2  ;;  %v306_v30 = vadd.f32 %v2284_v2, %v2979_v51  ;;  %v636_v31 = vadd.f32 %v2316_v6, %v2974_v49  ;;  %v3004_v32 = vmax.f32 %v346_v3, %v347_v17 }
 0x10f   :  { %v689_v23 = vrot.slane %v688_v15, 2  ;;  %v678_v34 = vmax.f32 %v676_v4, %v677_v18  ;;  %v335_v35 = vmax.f32 %v303_v19, 0.0  ;;  %v295_v36 = vadd.f32 %v2979_v51, %v294_v58  ;;  %v310_v37 = vpop.f32.mrf.mxu0 }
 0x110   :  { %v640_v38 = vpop.f32.mrf.mxu1  ;;  %v3007_v39 = vmax.f32 %v695_v7, %v696_v22  ;;  %v336_v41 = vmax.f32 %v306_v30, 0.0  ;;  %v666_v42 = vmax.f32 %v636_v31, 0.0  ;;  %v360_v43 = vmax.f32 %v358_v12, %v359_v26 }
 0x111   :  { %v690_v40 = vmax.f32 %v688_v15, %v689_v23  ;;  %v663_v44 = vmax.f32 %v625_v27, 0.0  ;;  %v298_v45 = vadd.f32 %v2979_v51, %v297_v9  ;;  %v628_v46 = vadd.f32 %v2974_v49, %v627_v13  ;;  %v2288_v57 = vpop.f32.mrf.mxu0 }
 0x112   :  { %v3011_v47 = vmax.f32 %v365_v14, %v366_v28  ;;  %v377_v48 = vmax.f32 %v335_v35, %v336_v41  ;;  %v707_v50 = vmax.f32 %v665_v29, %v666_v42  ;;  %v649_v52 = vadd.f32 %v2319_v21, %v2974_v49  ;;  %v2320_v58 = vpop.f32.mrf.mxu1 }
 0x113   :  { %v736_v53 = vsel %vm406_vm1, %v685_v25, %v678_v34  ;;  %v333_v54 = vmax.f32 %v295_v36, 0.0  ;;  %v334_v55 = vmax.f32 %v298_v45, 0.0  ;;  %v664_v56 = vmax.f32 %v628_v46, 0.0  ;;  %v313_v11 = vpop.f32.mrf.mxu0 }
 0x114   :  { %v691_v59 = vrot.slane %v690_v40, 1  ;;  %v378_v60 = vrot.slane %v377_v48, 4  ;;  %v708_v61 = vrot.slane %v707_v50, 4  ;;  %v319_v62 = vadd.f32 %v2287_v20, %v2979_v51  ;;  %v643_v12 = vpop.f32.mrf.mxu1 }
 0x115   :  { %v698_v63 = vrot.slane %v3007_v39, 1  ;;  %v361_v0 = vrot.slane %v360_v43, 1  ;;  %v370_v1 = vmax.f32 %v333_v54, %v334_v55  ;;  %v700_v2 = vmax.f32 %v663_v44, %v664_v56 }
 0x116   :  { %v379_v3 = vmax.f32 %v377_v48, %v378_v60  ;;  %v709_v4 = vmax.f32 %v707_v50, %v708_v61  ;;  %v669_v5 = vmax.f32 %v649_v52, 0.0  ;;  %v641_v6 = vadd.f32 %v2974_v49, %v640_v38 }
 0x117   :  { %v371_v7 = vrot.slane %v370_v1, 4  ;;  %v701_v8 = vrot.slane %v700_v2, 4  ;;  %v322_v9 = vadd.f32 %v2288_v57, %v2979_v51  ;;  %v652_v10 = vadd.f32 %v2320_v58, %v2974_v49 }
 0x118   :  { %v692_v13 = vmax.f32 %v690_v40, %v691_v59  ;;  %v710_v14 = vrot.slane %v709_v4, 2  ;;  %v339_v15 = vmax.f32 %v319_v62, 0.0  ;;  %v311_v16 = vadd.f32 %v2979_v51, %v310_v37 }
 0x119   :  { %v372_v17 = vmax.f32 %v370_v1, %v371_v7  ;;  %v702_v18 = vmax.f32 %v700_v2, %v701_v8  ;;  %v340_v19 = vmax.f32 %v322_v9, 0.0  ;;  %v670_v20 = vmax.f32 %v652_v10, 0.0 }
 0x11a   :  { %v380_v21 = vrot.slane %v379_v3, 2  ;;  %v667_v22 = vmax.f32 %v641_v6, 0.0  ;;  %v314_v23 = vadd.f32 %v2979_v51, %v313_v11  ;;  %v644_v25 = vadd.f32 %v2974_v49, %v643_v12 }
 0x11b   :  { %v373_v26 = vrot.slane %v372_v17, 2  ;;  %v703_v27 = vrot.slane %v702_v18, 2  ;;  %v391_v28 = vmax.f32 %v339_v15, %v340_v19  ;;  %v721_v29 = vmax.f32 %v669_v5, %v670_v20 }
 0x11c   :  { %v711_v30 = vmax.f32 %v709_v4, %v710_v14  ;;  %v337_v31 = vmax.f32 %v311_v16, 0.0  ;;  %v338_v34 = vmax.f32 %v314_v23, 0.0  ;;  %v668_v35 = vmax.f32 %v644_v25, 0.0 }
 0x11d   :  { %v374_v36 = vmax.f32 %v372_v17, %v373_v26  ;;  %v704_v37 = vmax.f32 %v702_v18, %v703_v27  ;;  %v392_v38 = vrot.slane %v391_v28, 4  ;;  %v722_v40 = vrot.slane %v721_v29, 4  ;;  %v2591_v27 = vld [vmem:[%s3440_s1 + $0x38] sm:$0xff]  }
 0x11e   :  { %v368_v41 = vrot.slane %v3011_v47, 1  ;;  %v699_v42 = vmax.f32 %v3007_v39, %v698_v63  ;;  %v384_v44 = vmax.f32 %v337_v31, %v338_v34  ;;  %v714_v51 = vmax.f32 %v667_v22, %v668_v35  ;;  %v2593_v31 = vld [vmem:[%s3440_s1 + $0x28] sm:$0xff]   ;;  %v2594_v34 = vld [vmem:[%s3440_s1 + $0x20] sm:$0xff]   ;;  %v2595_v35 = vld [vmem:[%s3440_s1 + $0x18] sm:$0xff]  }
 0x11f   :  { %v362_v45 = vmax.f32 %v360_v43, %v361_v0  ;;  %v705_v49 = vrot.slane %v704_v37, 1  ;;  %v393_v46 = vmax.f32 %v391_v28, %v392_v38  ;;  %v723_v48 = vmax.f32 %v721_v29, %v722_v40  ;;  %v2598_v38 = vld [vmem:[%s3440_s1] sm:$0xff]   ;;  %v2607_v40 = vld [vmem:[%s3441_s29 + $0x38] sm:$0xff]  }
 0x120   :  { %v737_v50 = vsel %vm408_vm2, %v692_v13, %v736_v53  ;;  %v375_v52 = vrot.slane %v374_v36, 1  ;;  %v385_v54 = vrot.slane %v384_v44, 4  ;;  %v715_v55 = vrot.slane %v714_v51, 4 }
 0x121   :  { %v381_v56 = vmax.f32 %v379_v3, %v380_v21  ;;  %v712_v57 = vrot.slane %v711_v30, 1  ;;  %v394_v58 = vrot.slane %v393_v46, 2  ;;  %v724_v59 = vrot.slane %v723_v48, 2 }
 0x122   :  { %v706_v60 = vmax.f32 %v704_v37, %v705_v49  ;;  %v386_v61 = vmax.f32 %v384_v44, %v385_v54  ;;  %v716_v62 = vmax.f32 %v714_v51, %v715_v55  ;;  %v407_v39 = vsel %vm406_vm1, %v2999_v24, %v3004_v32  ;;  %v2597_v37 = vld [vmem:[%s3440_s1 + $0x8] sm:$0xff]   ;;  %v2610_v44 = vld [vmem:[%s3441_s29 + $0x20] sm:$0xff]   ;;  %v2611_v51 = vld [vmem:[%s3441_s29 + $0x18] sm:$0xff]  }
 0x123   :  { %v738_v43 = vsel %vm410_vm3, %v699_v42, %v737_v50  ;;  %v395_v63 = vmax.f32 %v393_v46, %v394_v58  ;;  %v725_v0 = vmax.f32 %v723_v48, %v724_v59  ;;  %v409_v53 = vsel %vm408_vm2, %v362_v45, %v407_v39  ;;  %v2609_v42 = vld [vmem:[%s3441_s29 + $0x28] sm:$0xff]   ;;  %v2612_v45 = vld [vmem:[%s3441_s29 + $0x10] sm:$0xff]   ;;  %v2028_v46 = vld [vmem:[%s3442_s12] ss:$0 sm:$0xff] }
 0x124   :  { %v376_v1 = vmax.f32 %v374_v36, %v375_v52  ;;  %v387_v2 = vrot.slane %v386_v61, 2  ;;  %v717_v3 = vrot.slane %v716_v62, 2  ;;  %v369_v4 = vmax.f32 %v3011_v47, %v368_v41  ;;  %v2596_v36 = vld [vmem:[%s3440_s1 + $0x10] sm:$0xff]   ;;  %v2613_v49 = vld [vmem:[%s3441_s29 + $0x8] sm:$0xff]   ;;  %v2599_v59 = vld [vmem:[%s3443_s7 + $0x38] sm:$0xff]  }
 0x125   :  { %v382_v5 = vrot.slane %v381_v56, 1  ;;  %v713_v6 = vmax.f32 %v711_v30, %v712_v57  ;;  %v726_v7 = vrot.slane %v725_v0, 1  ;;  %v739_v8 = vsel %vm412_vm4, %v706_v60, %v738_v43  ;;  %v2592_v30 = vld [vmem:[%s3440_s1 + $0x30] sm:$0xff]   ;;  %v2601_v43 = vld [vmem:[%s3443_s7 + $0x28] sm:$0xff]  }
 0x126   :  { %v388_v9 = vmax.f32 %v386_v61, %v387_v2  ;;  %v718_v10 = vmax.f32 %v716_v62, %v717_v3  ;;  %v411_v24 = vsel %vm410_vm3, %v369_v4, %v409_v53  ;;  %v396_v32 = vrot.slane %v395_v63, 1  ;;  %v2608_v41 = vld [vmem:[%s3441_s29 + $0x30] sm:$0xff]   ;;  %v2605_v2 = vld [vmem:[%s3443_s7 + $0x8] sm:$0xff]   ;;  %v2606_v4 = vld [vmem:[%s3443_s7] sm:$0xff]  }
 0x127   :  { %v413_v11 = vsel %vm412_vm4, %v376_v1, %v411_v24  ;;  %v383_v14 = vmax.f32 %v381_v56, %v382_v5  ;;  %v727_v15 = vmax.f32 %v725_v0, %v726_v7  ;;  %v740_v16 = vsel %vm414_vm5, %v713_v6, %v739_v8  ;;  %v2600_v39 = vld [vmem:[%s3443_s7 + $0x30] sm:$0xff]   ;;  %v2603_v0 = vld [vmem:[%s3443_s7 + $0x18] sm:$0xff]   ;;  %v2037_v1 = vld [vmem:[%s3394_s9] ss:$0 sm:$0xff] }
 0x128   :  { %v389_v12 = vrot.slane %v388_v9, 1  ;;  %v719_v13 = vrot.slane %v718_v10, 1  ;;  %v397_v18 = vmax.f32 %v395_v63, %v396_v32  ;;  %v2602_v63 = vld [vmem:[%s3443_s7 + $0x20] sm:$0xff]   ;;  %v2604_v53 = vld [vmem:[%s3443_s7 + $0x10] sm:$0xff]  }
 0x129   :  { %v415_v19 = vsel %vm414_vm5, %v383_v14, %v413_v11  ;;  %v2614_v7 = vld [vmem:[%s3441_s29] sm:$0xff]  }
 0x12a   :  { %v390_v47 = vmax.f32 %v388_v9, %v389_v12  ;;  %v720_v17 = vmax.f32 %v718_v10, %v719_v13  ;;  %v2046_v8 = vld [vmem:[%s3397_s11] ss:$0 sm:$0xff]  ;;  %v2615_v12 = vld [vmem:[%s3395_s16 + $0x38] sm:$0xff]  }
 0x12c   :  { %v417_v20 = vsel %vm416_vm6, %v390_v47, %v415_v19  ;;  %v741_v21 = vsel %vm416_vm6, %v720_v17, %v740_v16  ;;  %v2617_v16 = vld [vmem:[%s3395_s16 + $0x28] sm:$0xff]   ;;  %v2618_v47 = vld [vmem:[%s3395_s16 + $0x20] sm:$0xff]   ;;  %v2619_v17 = vld [vmem:[%s3395_s16 + $0x18] sm:$0xff]  }
 0x12d   :  { %v419_v22 = vsel %vm418_vm7, %v397_v18, %v417_v20  ;;  %v742_v23 = vsel %vm418_vm7, %v727_v15, %v741_v21  ;;  %v2616_v15 = vld [vmem:[%s3395_s16 + $0x30] sm:$0xff]   ;;  %v2621_v19 = vld [vmem:[%s3395_s16 + $0x8] sm:$0xff]   ;;  %v2064_v20 = vld [vmem:[%s3398_s15] ss:$0 sm:$0xff] }
 0x12e   :  { %v421_v25 = vmax.f32 %v419_v22, 0.0  ;;  %v744_v26 = vmax.f32 %v742_v23, 0.0  ;;  %v2620_v18 = vld [vmem:[%s3395_s16 + $0x10] sm:$0xff]   ;;  %v2622_v22 = vld [vmem:[%s3395_s16] sm:$0xff]  }
 0x130   :  { %v766_v28 = vpack.c.bf16 %v421_v25, %v421_v25  ;;  %v880_v29 = vpack.c.bf16 %v744_v26, %v744_v26 }
 0x132   :  { %2338 = vmatmul.mubr.bf16.vlgmr.msra.gmra.mxu0 %v766_v28  ;;  %2358 = vmatmul.mubr.bf16.vlgmr.msra.gmra.mxu1 %v880_v29  ;;  %v2623_v28 = vld [vmem:[%s3396_s18 + $0x38] sm:$0xff]  }
 0x133   :  { %2362 = vmatpush3.bf16.msra.mxu0 %v2591_v27  ;;  %2377 = vmatprep.mubr.msk.bf16.mxu0 %vm2664_vm0, %v2663_v33 }
 0x134   :  { %2363 = vmatprep.subr.bf16.mxu0 %v2663_v33  ;;  %2397 = vmatprep.mubr.msk.bf16.mxu1 %vm2664_vm0, %v2663_v33 }
 0x135   :  { %2382 = vmatpush3.bf16.msra.mxu1 %v2607_v40  ;;  %v2630_v40 = vld [vmem:[%s3396_s18] sm:$0xff]  }
 0x136   :  { %2383 = vmatprep.subr.bf16.mxu1 %v2663_v33 }
 0x137   :  { %2364 = vmatpush3.bf16.msra.mxu0 %v2592_v30 }
 0x138   :  { %2365 = vmatprep.subr.bf16.mxu0 %v2663_v33 }
 0x139   :  { %2384 = vmatpush3.bf16.msra.mxu1 %v2608_v41  ;;  %v2631_v41 = vld [vmem:[%s3399_s19 + $0x38] sm:$0xff]  }
 0x13a   :  { %2385 = vmatprep.subr.bf16.mxu1 %v2663_v33 }
 0x13b   :  { %2366 = vmatpush3.bf16.msra.mxu0 %v2593_v31  ;;  %v2624_v31 = vld [vmem:[%s3396_s18 + $0x30] sm:$0xff]  }
 0x13c   :  { %2367 = vmatprep.subr.bf16.mxu0 %v2663_v33 }
 0x13d   :  { %2386 = vmatpush3.bf16.msra.mxu1 %v2609_v42  ;;  %v2632_v42 = vld [vmem:[%s3399_s19 + $0x30] sm:$0xff]  }
 0x13e   :  { %2387 = vmatprep.subr.bf16.mxu1 %v2663_v33 }
 0x13f   :  { %2368 = vmatpush3.bf16.msra.mxu0 %v2594_v34  ;;  %v2625_v34 = vld [vmem:[%s3396_s18 + $0x28] sm:$0xff]  }
 0x140   :  { %2369 = vmatprep.subr.bf16.mxu0 %v2663_v33 }
 0x141   :  { %2388 = vmatpush3.bf16.msra.mxu1 %v2610_v44  ;;  %v2633_v44 = vld [vmem:[%s3399_s19 + $0x28] sm:$0xff]  }
 0x142   :  { %2389 = vmatprep.subr.bf16.mxu1 %v2663_v33 }
 0x143   :  { %2370 = vmatpush3.bf16.msra.mxu0 %v2595_v35  ;;  %v2626_v35 = vld [vmem:[%s3396_s18 + $0x20] sm:$0xff]  }
 0x144   :  { %2371 = vmatprep.subr.bf16.mxu0 %v2663_v33 }
 0x145   :  { %2390 = vmatpush3.bf16.msra.mxu1 %v2611_v51  ;;  %v2634_v51 = vld [vmem:[%s3399_s19 + $0x20] sm:$0xff]  }
 0x146   :  { %2391 = vmatprep.subr.bf16.mxu1 %v2663_v33 }
 0x147   :  { %2372 = vmatpush3.bf16.msra.mxu0 %v2596_v36  ;;  %v2627_v36 = vld [vmem:[%s3396_s18 + $0x18] sm:$0xff]  }
 0x148   :  { %2373 = vmatprep.subr.bf16.mxu0 %v2663_v33 }
 0x149   :  { %2392 = vmatpush3.bf16.msra.mxu1 %v2612_v45  ;;  %v2635_v45 = vld [vmem:[%s3399_s19 + $0x18] sm:$0xff]  }
 0x14a   :  { %2393 = vmatprep.subr.bf16.mxu1 %v2663_v33 }
 0x14b   :  { %2374 = vmatpush3.bf16.msra.mxu0 %v2597_v37  ;;  %v2628_v37 = vld [vmem:[%s3396_s18 + $0x10] sm:$0xff]  }
 0x14c   :  { %2375 = vmatprep.subr.bf16.mxu0 %v2663_v33 }
 0x14d   :  { %2394 = vmatpush3.bf16.msra.mxu1 %v2613_v49  ;;  %v2636_v49 = vld [vmem:[%s3399_s19 + $0x10] sm:$0xff]  }
 0x14e   :  { %2395 = vmatprep.subr.bf16.mxu1 %v2663_v33 }
 0x14f   :  { %2376 = vmatpush3.bf16.msra.mxu0 %v2598_v38  ;;  %v2629_v38 = vld [vmem:[%s3396_s18 + $0x8] sm:$0xff]  }
 0x150   :  { %2401 = vmatprep.subr.bf16.mxu0 %v2663_v33 }
 0x151   :  { %2396 = vmatpush3.bf16.msra.mxu1 %v2614_v7  ;;  %v2643_v7 = vld [vmem:[%s3402_s21 + $0x18] sm:$0xff]  }
 0x152   :  { %2421 = vmatprep.subr.bf16.mxu1 %v2663_v33 }
 0x1f2   :  { %v856_v48 = vpop.f32.mrf.mxu0  ;;  %v970_v50 = vpop.f32.mrf.mxu1 }
 0x1f3   :  { %v857_v52 = vadd.f32 %v2028_v46, %v856_v48  ;;  %v971_v3 = vadd.f32 %v2037_v1, %v970_v50  ;;  %v2637_v46 = vld [vmem:[%s3399_s19 + $0x8] sm:$0xff]   ;;  %v2638_v48 = vld [vmem:[%s3399_s19] sm:$0xff]  }
 0x1f4   :  { %v2339_v54 = vpop.f32.mrf.mxu0  ;;  %v2359_v55 = vpop.f32.mrf.mxu1  ;;  %v2055_v50 = vld [vmem:[%s3400_s13] ss:$0 sm:$0xff] }
 0x1f5   :  { %v3102_v56 = vmax.f32 %v857_v52, 0.0  ;;  %v3141_v5 = vmax.f32 %v971_v3, 0.0  ;;  %v2639_v3 = vld [vmem:[%s3402_s21 + $0x38] sm:$0xff]  }
 0x1f6   :  { %v859_v57 = vpop.f32.mrf.mxu0  ;;  %v973_v58 = vpop.f32.mrf.mxu1 }
 0x1f7   :  { %v1011_v60 = vpack.c.bf16 %v3102_v56, %v3102_v56  ;;  %v1238_v6 = vpack.c.bf16 %v3141_v5, %v3141_v5 }
 0x1f8   :  { %v2340_v61 = vpop.f32.mrf.mxu0  ;;  %v2360_v62 = vpop.f32.mrf.mxu1 }
 0x1f9   :  { %2378 = vmatmul.mubr.bf16.vlgmr.msra.gmra.mxu0 %v1011_v60  ;;  %v2073_v62 = vld [vmem:[%s3401_s17] ss:$0 sm:$0xff] }
 0x1fa   :  { %2402 = vmatpush3.bf16.msra.mxu0 %v2599_v59  ;;  %2417 = vmatprep.mubr.msk.bf16.mxu0 %vm2664_vm0, %v2663_v33 }
 0x1fb   :  { %2403 = vmatprep.subr.bf16.mxu0 %v2663_v33 }
 0x1fe   :  { %2404 = vmatpush3.bf16.msra.mxu0 %v2600_v39 }
 0x1ff   :  { %2405 = vmatprep.subr.bf16.mxu0 %v2663_v33 }
 0x202   :  { %2406 = vmatpush3.bf16.msra.mxu0 %v2601_v43 }
 0x203   :  { %2407 = vmatprep.subr.bf16.mxu0 %v2663_v33 }
 0x206   :  { %2408 = vmatpush3.bf16.msra.mxu0 %v2602_v63 }
 0x207   :  { %2409 = vmatprep.subr.bf16.mxu0 %v2663_v33 }
 0x20a   :  { %2410 = vmatpush3.bf16.msra.mxu0 %v2603_v0 }
 0x20b   :  { %2411 = vmatprep.subr.bf16.mxu0 %v2663_v33 }
 0x20e   :  { %2412 = vmatpush3.bf16.msra.mxu0 %v2604_v53 }
 0x20f   :  { %2413 = vmatprep.subr.bf16.mxu0 %v2663_v33 }
 0x212   :  { %2414 = vmatpush3.bf16.msra.mxu0 %v2605_v2 }
 0x213   :  { %2415 = vmatprep.subr.bf16.mxu0 %v2663_v33 }
 0x216   :  { %2416 = vmatpush3.bf16.msra.mxu0 %v2606_v4  ;;  %v2640_v4 = vld [vmem:[%s3402_s21 + $0x30] sm:$0xff]  }
 0x217   :  { %2441 = vmatprep.subr.bf16.mxu0 %v2663_v33 }
 0x219   :  { %2418 = vmatmul.mubr.bf16.vlgmr.msra.gmra.mxu0 %v1238_v6  ;;  %v2642_v6 = vld [vmem:[%s3402_s21 + $0x20] sm:$0xff]  }
 0x21a   :  { %2457 = vmatprep.mubr.msk.bf16.mxu0 %vm2664_vm0, %v2663_v33  ;;  %2442 = vmatpush3.bf16.msra.mxu0 %v2631_v41 }
 0x21b   :  { %2443 = vmatprep.subr.bf16.mxu0 %v2663_v33 }
 0x21e   :  { %2444 = vmatpush3.bf16.msra.mxu0 %v2632_v42 }
 0x21f   :  { %2445 = vmatprep.subr.bf16.mxu0 %v2663_v33 }
 0x222   :  { %2446 = vmatpush3.bf16.msra.mxu0 %v2633_v44 }
 0x223   :  { %2447 = vmatprep.subr.bf16.mxu0 %v2663_v33 }
 0x226   :  { %2448 = vmatpush3.bf16.msra.mxu0 %v2634_v51 }
 0x227   :  { %2449 = vmatprep.subr.bf16.mxu0 %v2663_v33 }
 0x22a   :  { %2450 = vmatpush3.bf16.msra.mxu0 %v2635_v45 }
 0x22b   :  { %2451 = vmatprep.subr.bf16.mxu0 %v2663_v33 }
 0x22e   :  { %2452 = vmatpush3.bf16.msra.mxu0 %v2636_v49 }
 0x22f   :  { %2453 = vmatprep.subr.bf16.mxu0 %v2663_v33 }
 0x232   :  { %2454 = vmatpush3.bf16.msra.mxu0 %v2637_v46  ;;  %v2661_v46 = vld [vmem:[%s3405_s25 + $0x8] sm:$0xff]  }
 0x233   :  { %2455 = vmatprep.subr.bf16.mxu0 %v2663_v33 }
 0x236   :  { %2456 = vmatpush3.bf16.msra.mxu0 %v2638_v48  ;;  %v2662_v48 = vld [vmem:[%s3405_s25] sm:$0xff]  }
 0x237   :  { %2481 = vmatprep.subr.bf16.mxu0 %v2663_v33 }
 0x2b9   :  { %v1100_v9 = vpop.f32.mrf.mxu0 }
 0x2ba   :  { %v1101_v10 = vadd.f32 %v2046_v8, %v1100_v9  ;;  %v2644_v8 = vld [vmem:[%s3402_s21 + $0x10] sm:$0xff]   ;;  %v2645_v9 = vld [vmem:[%s3402_s21 + $0x8] sm:$0xff]  }
 0x2bb   :  { %v2379_v24 = vpop.f32.mrf.mxu0 }
 0x2bc   :  { %v1106_v32 = vmax.f32 %v1101_v10, 0.0  ;;  %v2646_v10 = vld [vmem:[%s3402_s21] sm:$0xff]   ;;  %v2647_v24 = vld [vmem:[%s3403_s23 + $0x38] sm:$0xff]  }
 0x2bd   :  { %v1103_v11 = vpop.f32.mrf.mxu0 }
 0x2be   :  { %v1107_v13 = vpack.c.bf16 %v1106_v32, %v1106_v32  ;;  %v2648_v32 = vld [vmem:[%s3403_s23 + $0x30] sm:$0xff]   ;;  %v2649_v11 = vld [vmem:[%s3403_s23 + $0x28] sm:$0xff]  }
 0x2bf   :  { %v2380_v14 = vpop.f32.mrf.mxu0 }
 0x2c0   :  { %2398 = vmatmul.mubr.bf16.vlgmr.msra.gmra.mxu1 %v1107_v13  ;;  %v2651_v13 = vld [vmem:[%s3403_s23 + $0x18] sm:$0xff]   ;;  %v2652_v14 = vld [vmem:[%s3403_s23 + $0x10] sm:$0xff]  }
 0x2c1   :  { %2422 = vmatpush3.bf16.msra.mxu1 %v2615_v12  ;;  %2437 = vmatprep.mubr.msk.bf16.mxu1 %vm2664_vm0, %v2663_v33  ;;  %v2650_v12 = vld [vmem:[%s3403_s23 + $0x20] sm:$0xff]  }
 0x2c2   :  { %2423 = vmatprep.subr.bf16.mxu1 %v2663_v33 }
 0x2c5   :  { %2424 = vmatpush3.bf16.msra.mxu1 %v2616_v15 }
 0x2c6   :  { %2425 = vmatprep.subr.bf16.mxu1 %v2663_v33 }
 0x2c9   :  { %2426 = vmatpush3.bf16.msra.mxu1 %v2617_v16 }
 0x2ca   :  { %2427 = vmatprep.subr.bf16.mxu1 %v2663_v33 }
 0x2cd   :  { %2428 = vmatpush3.bf16.msra.mxu1 %v2618_v47 }
 0x2ce   :  { %2429 = vmatprep.subr.bf16.mxu1 %v2663_v33 }
 0x2d1   :  { %2430 = vmatpush3.bf16.msra.mxu1 %v2619_v17 }
 0x2d2   :  { %2431 = vmatprep.subr.bf16.mxu1 %v2663_v33 }
 0x2d5   :  { %2432 = vmatpush3.bf16.msra.mxu1 %v2620_v18 }
 0x2d6   :  { %2433 = vmatprep.subr.bf16.mxu1 %v2663_v33 }
 0x2d9   :  { %v1327_v21 = vpop.f32.mrf.mxu0  ;;  %2434 = vmatpush3.bf16.msra.mxu1 %v2621_v19  ;;  %v2098_v19 = vld [vmem:[%s3444_s30] ss:$0 sm:$0xff] }
 0x2da   :  { %v1328_v23 = vadd.f32 %v2064_v20, %v1327_v21  ;;  %2435 = vmatprep.subr.bf16.mxu1 %v2663_v33 }
 0x2db   :  { %v2419_v25 = vpop.f32.mrf.mxu0 }
 0x2dc   :  { %v1333_v26 = vmax.f32 %v1328_v23, 0.0 }
 0x2dd   :  { %v1330_v27 = vpop.f32.mrf.mxu0  ;;  %2436 = vmatpush3.bf16.msra.mxu1 %v2622_v22 }
 0x2de   :  { %v1334_v29 = vpack.c.bf16 %v1333_v26, %v1333_v26  ;;  %2461 = vmatprep.subr.bf16.mxu1 %v2663_v33 }
 0x2df   :  { %v2420_v30 = vpop.f32.mrf.mxu0 }
 0x2e0   :  { %2438 = vmatmul.mubr.bf16.vlgmr.msra.gmra.mxu1 %v1334_v29  ;;  %v2654_v29 = vld [vmem:[%s3403_s23] sm:$0xff]   ;;  %v2655_v30 = vld [vmem:[%s3405_s25 + $0x38] sm:$0xff]  }
 0x2e1   :  { %2462 = vmatpush3.bf16.msra.mxu1 %v2623_v28  ;;  %2477 = vmatprep.mubr.msk.bf16.mxu1 %vm2664_vm0, %v2663_v33  ;;  %v2653_v28 = vld [vmem:[%s3403_s23 + $0x8] sm:$0xff]  }
 0x2e2   :  { %2463 = vmatprep.subr.bf16.mxu1 %v2663_v33 }
 0x2e5   :  { %2464 = vmatpush3.bf16.msra.mxu1 %v2624_v31  ;;  %v2656_v31 = vld [vmem:[%s3405_s25 + $0x30] sm:$0xff]  }
 0x2e6   :  { %2465 = vmatprep.subr.bf16.mxu1 %v2663_v33 }
 0x2e9   :  { %2466 = vmatpush3.bf16.msra.mxu1 %v2625_v34  ;;  %v2657_v34 = vld [vmem:[%s3405_s25 + $0x28] sm:$0xff]  }
 0x2ea   :  { %2467 = vmatprep.subr.bf16.mxu1 %v2663_v33 }
 0x2ed   :  { %2468 = vmatpush3.bf16.msra.mxu1 %v2626_v35  ;;  %v2658_v35 = vld [vmem:[%s3405_s25 + $0x20] sm:$0xff]  }
 0x2ee   :  { %2469 = vmatprep.subr.bf16.mxu1 %v2663_v33 }
 0x2f1   :  { %2470 = vmatpush3.bf16.msra.mxu1 %v2627_v36  ;;  %v2659_v36 = vld [vmem:[%s3405_s25 + $0x18] sm:$0xff]  }
 0x2f2   :  { %2471 = vmatprep.subr.bf16.mxu1 %v2663_v33 }
 0x2f5   :  { %2472 = vmatpush3.bf16.msra.mxu1 %v2628_v37  ;;  %v2660_v37 = vld [vmem:[%s3405_s25 + $0x10] sm:$0xff]  }
 0x2f6   :  { %2473 = vmatprep.subr.bf16.mxu1 %v2663_v33 }
 0x2f9   :  { %2474 = vmatpush3.bf16.msra.mxu1 %v2629_v38  ;;  %v2099_v38 = vld [vmem:[%s3406_s22] ss:$0 sm:$0xff] }
 0x2fa   :  { %2475 = vmatprep.subr.bf16.mxu1 %v2663_v33 }
 0x2fd   :  { %2476 = vmatpush3.bf16.msra.mxu1 %v2630_v40 }
 0x2fe   :  { %2501 = vmatprep.subr.bf16.mxu1 %v2663_v33 }
 0x380   :  { %v1196_v52 = vpop.f32.mrf.mxu1 }
 0x381   :  { %v1197_v54 = vadd.f32 %v2055_v50, %v1196_v52  ;;  %v2108_v50 = vld [vmem:[%s3407_s24] ss:$0 sm:$0xff] }
 0x382   :  { %v2399_v55 = vpop.f32.mrf.mxu1 }
 0x383   :  { %v1202_v57 = vadd.f32 %v1197_v54, %v3102_v56 }
 0x384   :  { %v1199_v58 = vpop.f32.mrf.mxu1 }
 0x385   :  { %v1203_v59 = vmax.f32 %v1202_v57, 0.0 }
 0x386   :  { %v2400_v60 = vpop.f32.mrf.mxu1 }
 0x387   :  { %v1447_v61 = vpack.c.bf16 %v1203_v59, %v1203_v59 }
 0x389   :  { %2478 = vmatmul.mubr.bf16.vlgmr.msra.gmra.mxu1 %v1447_v61 }
 0x38a   :  { %2517 = vmatprep.mubr.msk.bf16.mxu1 %vm2664_vm0, %v2663_v33  ;;  %2502 = vmatpush3.bf16.msra.mxu1 %v2647_v24 }
 0x38b   :  { %2503 = vmatprep.subr.bf16.mxu1 %v2663_v33 }
 0x38e   :  { %2504 = vmatpush3.bf16.msra.mxu1 %v2648_v32 }
 0x38f   :  { %2505 = vmatprep.subr.bf16.mxu1 %v2663_v33 }
 0x392   :  { %2506 = vmatpush3.bf16.msra.mxu1 %v2649_v11 }
 0x393   :  { %2507 = vmatprep.subr.bf16.mxu1 %v2663_v33 }
 0x396   :  { %2508 = vmatpush3.bf16.msra.mxu1 %v2650_v12 }
 0x397   :  { %2509 = vmatprep.subr.bf16.mxu1 %v2663_v33 }
 0x39a   :  { %2510 = vmatpush3.bf16.msra.mxu1 %v2651_v13 }
 0x39b   :  { %2511 = vmatprep.subr.bf16.mxu1 %v2663_v33 }
 0x39e   :  { %2512 = vmatpush3.bf16.msra.mxu1 %v2652_v14 }
 0x39f   :  { %2513 = vmatprep.subr.bf16.mxu1 %v2663_v33 }
 0x3a0   :  { %v1423_v39 = vpop.f32.mrf.mxu1 }
 0x3a1   :  { %v1424_v43 = vadd.f32 %v2073_v62, %v1423_v39 }
 0x3a2   :  { %v2439_v63 = vpop.f32.mrf.mxu1  ;;  %2514 = vmatpush3.bf16.msra.mxu1 %v2653_v28 }
 0x3a3   :  { %v1429_v0 = vadd.f32 %v1424_v43, %v3141_v5  ;;  %v2641_v5 = vld [vmem:[%s3402_s21 + $0x28] sm:$0xff]   ;;  %2515 = vmatprep.subr.bf16.mxu1 %v2663_v33 }
 0x3a4   :  { %v1426_v53 = vpop.f32.mrf.mxu1 }
 0x3a5   :  { %v1430_v1 = vmax.f32 %v1429_v0, 0.0 }
 0x3a6   :  { %v2440_v56 = vpop.f32.mrf.mxu1  ;;  %2516 = vmatpush3.bf16.msra.mxu1 %v2654_v29 }
 0x3a7   :  { %v1464_v2 = vpack.c.bf16 %v1430_v1, %v1430_v1 }
 0x3a9   :  { %2458 = vmatmul.mubr.bf16.vlgmr.msra.gmra.mxu0 %v1464_v2 }
 0x3aa   :  { %2497 = vmatprep.mubr.msk.bf16.mxu0 %vm2664_vm0, %v2663_v33  ;;  %2482 = vmatpush3.bf16.msra.mxu0 %v2639_v3 }
 0x3ab   :  { %2483 = vmatprep.subr.bf16.mxu0 %v2663_v33 }
 0x3ae   :  { %2484 = vmatpush3.bf16.msra.mxu0 %v2640_v4 }
 0x3af   :  { %2485 = vmatprep.subr.bf16.mxu0 %v2663_v33 }
 0x3b2   :  { %2486 = vmatpush3.bf16.msra.mxu0 %v2641_v5 }
 0x3b3   :  { %2487 = vmatprep.subr.bf16.mxu0 %v2663_v33 }
 0x3b6   :  { %2488 = vmatpush3.bf16.msra.mxu0 %v2642_v6 }
 0x3b7   :  { %2489 = vmatprep.subr.bf16.mxu0 %v2663_v33 }
 0x3ba   :  { %2490 = vmatpush3.bf16.msra.mxu0 %v2643_v7 }
 0x3bb   :  { %2491 = vmatprep.subr.bf16.mxu0 %v2663_v33 }
 0x3be   :  { %2492 = vmatpush3.bf16.msra.mxu0 %v2644_v8 }
 0x3bf   :  { %2493 = vmatprep.subr.bf16.mxu0 %v2663_v33 }
 0x3c2   :  { %2494 = vmatpush3.bf16.msra.mxu0 %v2645_v9 }
 0x3c3   :  { %2495 = vmatprep.subr.bf16.mxu0 %v2663_v33 }
 0x3c6   :  { %2496 = vmatpush3.bf16.msra.mxu0 %v2646_v10 }
 0x3c7   :  { %2521 = vmatprep.subr.bf16.mxu0 %v2663_v33 }
 0x449   :  { %v1635_v15 = vpop.f32.mrf.mxu1 }
 0x44b   :  { %v2479_v16 = vpop.f32.mrf.mxu1 }
 0x44d   :  { %v1638_v47 = vpop.f32.mrf.mxu1 }
 0x44f   :  { %v2480_v17 = vpop.f32.mrf.mxu1 }
 0x469   :  { %v1547_v18 = vpop.f32.mrf.mxu0 }
 0x46a   :  { %v1636_v20 = vadd.f32 %v1635_v15, %v1547_v18 }
 0x46b   :  { %v2459_v21 = vpop.f32.mrf.mxu0 }
 0x46c   :  { %v1648_v22 = vadd.f32 %v2098_v19, %v1636_v20 }
 0x46d   :  { %v1550_v23 = vpop.f32.mrf.mxu0 }
 0x46e   :  { %v1649_v25 = vmax.f32 %v1648_v22, 0.0 }
 0x46f   :  { %v2460_v26 = vpop.f32.mrf.mxu0 }
 0x470   :  { %v1684_v27 = vpack.c.bf16 %v1649_v25, %v1649_v25 }
 0x472   :  { %2498 = vmatmul.mubr.bf16.vlgmr.msra.gmra.mxu0 %v1684_v27 }
 0x473   :  { %2537 = vmatprep.mubr.msk.bf16.mxu0 %vm2664_vm0, %v2663_v33  ;;  %2522 = vmatpush3.bf16.msra.mxu0 %v2655_v30 }
 0x474   :  { %2523 = vmatprep.subr.bf16.mxu0 %v2663_v33 }
 0x477   :  { %2524 = vmatpush3.bf16.msra.mxu0 %v2656_v31 }
 0x478   :  { %2525 = vmatprep.subr.bf16.mxu0 %v2663_v33 }
 0x47b   :  { %2526 = vmatpush3.bf16.msra.mxu0 %v2657_v34 }
 0x47c   :  { %2527 = vmatprep.subr.bf16.mxu0 %v2663_v33 }
 0x47f   :  { %2528 = vmatpush3.bf16.msra.mxu0 %v2658_v35 }
 0x480   :  { %2529 = vmatprep.subr.bf16.mxu0 %v2663_v33 }
 0x483   :  { %2530 = vmatpush3.bf16.msra.mxu0 %v2659_v36 }
 0x484   :  { %2531 = vmatprep.subr.bf16.mxu0 %v2663_v33 }
 0x487   :  { %2532 = vmatpush3.bf16.msra.mxu0 %v2660_v37 }
 0x488   :  { %2533 = vmatprep.subr.bf16.mxu0 %v2663_v33 }
 0x48b   :  { %2534 = vmatpush3.bf16.msra.mxu0 %v2661_v46 }
 0x48c   :  { %2535 = vmatprep.subr.bf16.mxu0 %v2663_v33  ;;  %v2117_v33 = vld [vmem:[%s3408_s26] ss:$0 sm:$0xff] }
 0x48f   :  { %2536 = vmatpush3.bf16.msra.mxu0 %v2662_v48 }
 0x532   :  { %v1773_v40 = vpop.f32.mrf.mxu0 }
 0x533   :  { %v1774_v41 = vadd.f32 %v2099_v38, %v1773_v40 }
 0x534   :  { %v2499_v42 = vpop.f32.mrf.mxu0 }
 0x535   :  { %v1779_v44 = vmax.f32 %v1774_v41, 0.0 }
 0x536   :  { %v1776_v51 = vpop.f32.mrf.mxu0 }
 0x537   :  { %v1780_v45 = vpack.c.bf16 %v1779_v44, %v1779_v44 }
 0x538   :  { %v2500_v49 = vpop.f32.mrf.mxu0 }
 0x539   :  { %2518 = vmatmul.mubr.bf16.vlgmr.msra.gmra.mxu1 %v1780_v45 }
 0x5f9   :  { %v1869_v52 = vpop.f32.mrf.mxu1 }
 0x5fa   :  { %v1870_v54 = vadd.f32 %v2108_v50, %v1869_v52 }
 0x5fb   :  { %v2519_v55 = vpop.f32.mrf.mxu1 }
 0x5fc   :  { %v1875_v57 = vadd.f32 %v1870_v54, %v1649_v25 }
 0x5fd   :  { %v1872_v58 = vpop.f32.mrf.mxu1 }
 0x5fe   :  { %v1876_v59 = vmax.f32 %v1875_v57, 0.0 }
 0x5ff   :  { %v2520_v60 = vpop.f32.mrf.mxu1 }
 0x600   :  { %v1893_v61 = vpack.c.bf16 %v1876_v59, %v1876_v59 }
 0x602   :  { %2538 = vmatmul.mubr.bf16.vlgmr.msra.gmra.mxu0 %v1893_v61 }
 0x6c2   :  { %v1983_v62 = vpop.f32.mrf.mxu0 }
 0x6c3   :  { %v1984_v39 = vadd.f32 %v2117_v33, %v1983_v62 }
 0x6c4   :  { %v2539_v43 = vpop.f32.mrf.mxu0 }
 0x6c5   :  { %1989 = vst [vmem:[%s3409_s27] sm:$0xff] %v1984_v39 }
 0x6c6   :  { %v1986_v63 = vpop.f32.mrf.mxu0 }
 0x6c8   :  { %v2540_v0 = vpop.f32.mrf.mxu0 }

</bundles_post_ra>
